<compile_context>
chip_gen: v7x
topology: tpu7x:2x2x1
jax: 0.10.0
libtpu: 0.0.40
codegen_flags: <defaults>
</compile_context>

<pallas_src>
import functools

import jax
import jax.numpy as jnp
from jax.experimental import pallas as pl
from jax.experimental.pallas import tpu as pltpu


# ----------------------------------------------------------------------------
# Fused kernel
# ----------------------------------------------------------------------------
def _spatial_attention_kernel(w_ref, x_ref, o_ref, *, H, W, ksize):
    # w_ref : SMEM (2*k*k,) f32   flattened Conv2d weight [out=1, in=2, kh, kw]
    # x_ref : VMEM (C, H*W)       one batch element, spatial dims flattened (lane-dense)
    # o_ref : VMEM (C, H*W)
    C, HW = x_ref.shape
    pad = (ksize - 1) // 2
    kk = ksize * ksize

    x = x_ref[...]                                                   # (C, HW) native dtype

    # --- ChannelPool: max/mean over channels (lane-dense VPU/XLU reduce) ----
    mx = jnp.max(x, axis=0, keepdims=True).astype(jnp.float32)       # (1, HW)
    mn = jnp.sum(x, axis=0, keepdims=True,
                 dtype=jnp.float32) * (1.0 / C)                      # (1, HW)

    # --- exact column index (pos mod W) without vector integer division -----
    pos = jax.lax.broadcasted_iota(jnp.int32, (1, HW), 1)
    q = (pos.astype(jnp.float32) * (1.0 / W)).astype(jnp.int32)      # ~floor(pos/W), off<=1
    col = pos - q * W
    col = jnp.where(col < 0, col + W, col)
    col = jnp.where(col >= W, col - W, col)

    col_ok = []
    for dj in range(ksize):
        d = dj - pad
        if d < 0:
            col_ok.append(col >= -d)
        elif d > 0:
            col_ok.append(col < W - d)
        else:
            col_ok.append(None)                                      # center column: no mask

    # --- 5x5x2 -> 1 conv on the flat pooled maps ----------------------------
    # One zero pad of pad*W+pad on each side handles ROW out-of-bounds; COLUMN
    # out-of-bounds handled by the masks above.  Per tap: combine the two pooled
    # maps with the scalar weights first so only 25 shifted slices are needed.
    P = pad * W + pad
    zpad = jnp.zeros((1, P), jnp.float32)
    mx_p = jnp.concatenate([zpad, mx, zpad], axis=1)                 # (1, HW + 2P)
    mn_p = jnp.concatenate([zpad, mn, zpad], axis=1)

    acc = jnp.zeros((1, HW), jnp.float32)
    for di in range(ksize):
        for dj in range(ksize):
            w_max = w_ref[di * ksize + dj]                           # channel 0: max pool
            w_mean = w_ref[kk + di * ksize + dj]                     # channel 1: mean pool
            comb = w_max * mx_p + w_mean * mn_p                      # (1, HW + 2P)
            off = di * W + dj                                        # (di-pad)*W+(dj-pad)+P
            term = comb[:, off:off + HW]
            if col_ok[dj] is not None:
                term = jnp.where(col_ok[dj], term, 0.0)
            acc = acc + term

    # --- sigmoid (EUP exp + reciprocal) and apply in the native dtype -------
    scale = pl.reciprocal(1.0 + jnp.exp(-acc), approx=False)         # (1, HW) f32
    o_ref[...] = x * scale.astype(x.dtype)                           # broadcast over C


# ----------------------------------------------------------------------------
# Wrapper
# ----------------------------------------------------------------------------
def spatial_attention(x, w, *, ksize=5):
    """x: [B, C, H, W] (NCHW); w: [1, 2, k, k] Conv2d weight (no bias).

    Returns x * sigmoid(conv2d(cat(max_c(x), mean_c(x)), w, padding=k//2)).
    """
    B, C, H, W = x.shape
    assert w.shape == (1, 2, ksize, ksize), w.shape
    HW = H * W

    x_flat = x.reshape(B, C, HW)                    # zero-cost row-major view in HBM
    w_flat = w.reshape(-1).astype(jnp.float32)      # (2*k*k,) scalars -> SMEM

    block_bytes = C * HW * jnp.dtype(x.dtype).itemsize
    vmem_limit = int(max(32 * 1024 * 1024,
                         min(4 * block_bytes + (4 << 20), 48 * 1024 * 1024)))

    kernel = functools.partial(_spatial_attention_kernel, H=H, W=W, ksize=ksize)
    out = pl.pallas_call(
        kernel,
        out_shape=jax.ShapeDtypeStruct((B, C, HW), x.dtype),
        grid=(B,),
        in_specs=[
            pl.BlockSpec((2 * ksize * ksize,), lambda b: (0,),
                         memory_space=pltpu.MemorySpace.SMEM),       # conv weights
            pl.BlockSpec((None, C, HW), lambda b: (b, 0, 0)),        # x tile (lane-dense)
        ],
        out_specs=pl.BlockSpec((None, C, HW), lambda b: (b, 0, 0)),
        compiler_params=pltpu.CompilerParams(
            dimension_semantics=("parallel",),
            vmem_limit_bytes=vmem_limit),
    )(w_flat, x_flat)
    return out.reshape(B, C, H, W)


# ----------------------------------------------------------------------------
# Pure-JAX reference (mirrors the PyTorch module exactly)
# ----------------------------------------------------------------------------
def _reference(x, w):
    mx = jnp.max(x, axis=1, keepdims=True)
    mn = jnp.mean(x, axis=1, keepdims=True)
    comp = jnp.concatenate([mx, mn], axis=1)                         # [B, 2, H, W]
    pad = (w.shape[-1] - 1) // 2
    out = jax.lax.conv_general_dilated(
        comp, w, window_strides=(1, 1),
        padding=((pad, pad), (pad, pad)),
        dimension_numbers=("NCHW", "OIHW", "NCHW"))                  # [B, 1, H, W]
    return x * jax.nn.sigmoid(out)


# ----------------------------------------------------------------------------
if __name__ == "__main__":
    key = jax.random.PRNGKey(0)
    kx, kw = jax.random.split(key)

    B, C, H, W = 2, 4, 16, 16
    x = jax.random.normal(kx, (B, C, H, W), jnp.float32)             # NCHW input
    # Conv2d(2, 1, kernel_size=5, padding=2, bias=False) weight: [1, 2, 5, 5]
    w = jax.random.normal(kw, (1, 2, 5, 5), jnp.float32) * 0.1

    fwd = jax.jit(spatial_attention)
    out = jax.block_until_ready(fwd(x, w))

    ref = _reference(x, w)
    assert out.shape == (B, C, H, W), out.shape
    assert bool(jnp.all(jnp.isfinite(out)))
    err = float(jnp.max(jnp.abs(out - ref)))
    assert err < 1e-3, err
    print("KERNEL_OK")
</pallas_src>

<mosaic_0001>
module attributes {stable_mosaic.version = 11 : i64} {
  func.func @_spatial_attention_kernel(%arg0: i32, %arg1: memref<50xf32, #tpu.memory_space<smem>>, %arg2: memref<1x4x256xf32, #tpu.memory_space<vmem>>, %arg3: memref<1x4x256xf32, #tpu.memory_space<vmem>>) attributes {dimension_semantics = [#tpu.dimension_semantics<parallel>], iteration_bounds = array<i64: 2>, scalar_prefetch = 0 : i64, scratch_operands = 0 : i64, tpu.core_type = #tpu.core_type<tc>, window_params = [{transform_indices = @transform_0, window_bounds = array<i64: 50>}, {transform_indices = @transform_1, window_bounds = array<i64: 1, 4, 256>}, {transform_indices = @transform_2, window_bounds = array<i64: 1, 4, 256>}]} {
    %c0 = arith.constant 0 : index
    %c0_0 = arith.constant 0 : index
    %c0_1 = arith.constant 0 : index
    %0 = vector.load %arg2[%c0, %c0_0, %c0_1] : memref<1x4x256xf32, #tpu.memory_space<vmem>>, vector<1x4x256xf32>
    %1 = vector.shape_cast %0 : vector<1x4x256xf32> to vector<4x256xf32>
    %cst = arith.constant dense<0xFF800000> : vector<256xf32>
    %2 = vector.multi_reduction <maximumf>, %1, %cst [0] : vector<4x256xf32> to vector<256xf32>
    %3 = vector.shape_cast %2 : vector<256xf32> to vector<1x256xf32>
    %cst_2 = arith.constant dense<0.000000e+00> : vector<256xf32>
    %4 = vector.multi_reduction <add>, %1, %cst_2 [0] : vector<4x256xf32> to vector<256xf32>
    %5 = vector.shape_cast %4 : vector<256xf32> to vector<1x256xf32>
    %cst_3 = arith.constant 2.500000e-01 : f32
    %6 = vector.broadcast %cst_3 : f32 to vector<1x256xf32>
    %7 = arith.mulf %5, %6 : vector<1x256xf32>
    %8 = tpu.iota {dimensions = array<i32: 1>} : vector<1x256xi32>
    %9 = arith.sitofp %8 : vector<1x256xi32> to vector<1x256xf32>
    %cst_4 = arith.constant 6.250000e-02 : f32
    %10 = vector.broadcast %cst_4 : f32 to vector<1x256xf32>
    %11 = arith.mulf %9, %10 : vector<1x256xf32>
    %12 = arith.fptosi %11 : vector<1x256xf32> to vector<1x256xi32>
    %c16_i32 = arith.constant 16 : i32
    %13 = vector.broadcast %c16_i32 : i32 to vector<1x256xi32>
    %14 = arith.muli %12, %13 : vector<1x256xi32>
    %15 = arith.subi %8, %14 : vector<1x256xi32>
    %c0_i32 = arith.constant 0 : i32
    %16 = vector.broadcast %c0_i32 : i32 to vector<1x256xi32>
    %17 = arith.cmpi slt, %15, %16 : vector<1x256xi32>
    %c16_i32_5 = arith.constant 16 : i32
    %18 = vector.broadcast %c16_i32_5 : i32 to vector<1x256xi32>
    %19 = arith.addi %15, %18 : vector<1x256xi32>
    %20 = arith.select %17, %19, %15 : vector<1x256xi1>, vector<1x256xi32>
    %c16_i32_6 = arith.constant 16 : i32
    %21 = vector.broadcast %c16_i32_6 : i32 to vector<1x256xi32>
    %22 = arith.cmpi sge, %20, %21 : vector<1x256xi32>
    %c16_i32_7 = arith.constant 16 : i32
    %23 = vector.broadcast %c16_i32_7 : i32 to vector<1x256xi32>
    %24 = arith.subi %20, %23 : vector<1x256xi32>
    %25 = arith.select %22, %24, %20 : vector<1x256xi1>, vector<1x256xi32>
    %c2_i32 = arith.constant 2 : i32
    %26 = vector.broadcast %c2_i32 : i32 to vector<1x256xi32>
    %27 = arith.cmpi sge, %25, %26 : vector<1x256xi32>
    %c1_i32 = arith.constant 1 : i32
    %28 = vector.broadcast %c1_i32 : i32 to vector<1x256xi32>
    %29 = arith.cmpi sge, %25, %28 : vector<1x256xi32>
    %c15_i32 = arith.constant 15 : i32
    %30 = vector.broadcast %c15_i32 : i32 to vector<1x256xi32>
    %31 = arith.cmpi slt, %25, %30 : vector<1x256xi32>
    %c14_i32 = arith.constant 14 : i32
    %32 = vector.broadcast %c14_i32 : i32 to vector<1x256xi32>
    %33 = arith.cmpi slt, %25, %32 : vector<1x256xi32>
    %cst_8 = arith.constant 0.000000e+00 : f32
    %34 = vector.broadcast %cst_8 : f32 to vector<1x34xf32>
    %35 = tpu.concatenate %34, %3, %34 in 1 : vector<1x34xf32>, vector<1x256xf32>, vector<1x34xf32> -> vector<1x324xf32>
    %36 = tpu.concatenate %34, %7, %34 in 1 : vector<1x34xf32>, vector<1x256xf32>, vector<1x34xf32> -> vector<1x324xf32>
    %cst_9 = arith.constant 0.000000e+00 : f32
    %37 = vector.broadcast %cst_9 : f32 to vector<1x256xf32>
    %c0_10 = arith.constant 0 : index
    %38 = memref.load %arg1[%c0_10] : memref<50xf32, #tpu.memory_space<smem>>
    %c25 = arith.constant 25 : index
    %39 = memref.load %arg1[%c25] : memref<50xf32, #tpu.memory_space<smem>>
    %40 = vector.broadcast %38 : f32 to vector<1x324xf32>
    %41 = arith.mulf %40, %35 : vector<1x324xf32>
    %42 = vector.broadcast %39 : f32 to vector<1x324xf32>
    %43 = arith.mulf %42, %36 : vector<1x324xf32>
    %44 = arith.addf %41, %43 : vector<1x324xf32>
    %45 = vector.extract_strided_slice %44 {offsets = [0, 0], sizes = [1, 256], strides = [1, 1]} : vector<1x324xf32> to vector<1x256xf32>
    %cst_11 = arith.constant 0.000000e+00 : f32
    %46 = vector.broadcast %cst_11 : f32 to vector<1x256xf32>
    %47 = arith.select %27, %45, %46 : vector<1x256xi1>, vector<1x256xf32>
    %48 = arith.addf %37, %47 : vector<1x256xf32>
    %c1 = arith.constant 1 : index
    %49 = memref.load %arg1[%c1] : memref<50xf32, #tpu.memory_space<smem>>
    %c26 = arith.constant 26 : index
    %50 = memref.load %arg1[%c26] : memref<50xf32, #tpu.memory_space<smem>>
    %51 = vector.broadcast %49 : f32 to vector<1x324xf32>
    %52 = arith.mulf %51, %35 : vector<1x324xf32>
    %53 = vector.broadcast %50 : f32 to vector<1x324xf32>
    %54 = arith.mulf %53, %36 : vector<1x324xf32>
    %55 = arith.addf %52, %54 : vector<1x324xf32>
    %56 = vector.extract_strided_slice %55 {offsets = [0, 1], sizes = [1, 256], strides = [1, 1]} : vector<1x324xf32> to vector<1x256xf32>
    %cst_12 = arith.constant 0.000000e+00 : f32
    %57 = vector.broadcast %cst_12 : f32 to vector<1x256xf32>
    %58 = arith.select %29, %56, %57 : vector<1x256xi1>, vector<1x256xf32>
    %59 = arith.addf %48, %58 : vector<1x256xf32>
    %c2 = arith.constant 2 : index
    %60 = memref.load %arg1[%c2] : memref<50xf32, #tpu.memory_space<smem>>
    %c27 = arith.constant 27 : index
    %61 = memref.load %arg1[%c27] : memref<50xf32, #tpu.memory_space<smem>>
    %62 = vector.broadcast %60 : f32 to vector<1x324xf32>
    %63 = arith.mulf %62, %35 : vector<1x324xf32>
    %64 = vector.broadcast %61 : f32 to vector<1x324xf32>
    %65 = arith.mulf %64, %36 : vector<1x324xf32>
    %66 = arith.addf %63, %65 : vector<1x324xf32>
    %67 = vector.extract_strided_slice %66 {offsets = [0, 2], sizes = [1, 256], strides = [1, 1]} : vector<1x324xf32> to vector<1x256xf32>
    %68 = arith.addf %59, %67 : vector<1x256xf32>
    %c3 = arith.constant 3 : index
    %69 = memref.load %arg1[%c3] : memref<50xf32, #tpu.memory_space<smem>>
    %c28 = arith.constant 28 : index
    %70 = memref.load %arg1[%c28] : memref<50xf32, #tpu.memory_space<smem>>
    %71 = vector.broadcast %69 : f32 to vector<1x324xf32>
    %72 = arith.mulf %71, %35 : vector<1x324xf32>
    %73 = vector.broadcast %70 : f32 to vector<1x324xf32>
    %74 = arith.mulf %73, %36 : vector<1x324xf32>
    %75 = arith.addf %72, %74 : vector<1x324xf32>
    %76 = vector.extract_strided_slice %75 {offsets = [0, 3], sizes = [1, 256], strides = [1, 1]} : vector<1x324xf32> to vector<1x256xf32>
    %cst_13 = arith.constant 0.000000e+00 : f32
    %77 = vector.broadcast %cst_13 : f32 to vector<1x256xf32>
    %78 = arith.select %31, %76, %77 : vector<1x256xi1>, vector<1x256xf32>
    %79 = arith.addf %68, %78 : vector<1x256xf32>
    %c4 = arith.constant 4 : index
    %80 = memref.load %arg1[%c4] : memref<50xf32, #tpu.memory_space<smem>>
    %c29 = arith.constant 29 : index
    %81 = memref.load %arg1[%c29] : memref<50xf32, #tpu.memory_space<smem>>
    %82 = vector.broadcast %80 : f32 to vector<1x324xf32>
    %83 = arith.mulf %82, %35 : vector<1x324xf32>
    %84 = vector.broadcast %81 : f32 to vector<1x324xf32>
    %85 = arith.mulf %84, %36 : vector<1x324xf32>
    %86 = arith.addf %83, %85 : vector<1x324xf32>
    %87 = vector.extract_strided_slice %86 {offsets = [0, 4], sizes = [1, 256], strides = [1, 1]} : vector<1x324xf32> to vector<1x256xf32>
    %cst_14 = arith.constant 0.000000e+00 : f32
    %88 = vector.broadcast %cst_14 : f32 to vector<1x256xf32>
    %89 = arith.select %33, %87, %88 : vector<1x256xi1>, vector<1x256xf32>
    %90 = arith.addf %79, %89 : vector<1x256xf32>
    %c5 = arith.constant 5 : index
    %91 = memref.load %arg1[%c5] : memref<50xf32, #tpu.memory_space<smem>>
    %c30 = arith.constant 30 : index
    %92 = memref.load %arg1[%c30] : memref<50xf32, #tpu.memory_space<smem>>
    %93 = vector.broadcast %91 : f32 to vector<1x324xf32>
    %94 = arith.mulf %93, %35 : vector<1x324xf32>
    %95 = vector.broadcast %92 : f32 to vector<1x324xf32>
    %96 = arith.mulf %95, %36 : vector<1x324xf32>
    %97 = arith.addf %94, %96 : vector<1x324xf32>
    %98 = vector.extract_strided_slice %97 {offsets = [0, 16], sizes = [1, 256], strides = [1, 1]} : vector<1x324xf32> to vector<1x256xf32>
    %cst_15 = arith.constant 0.000000e+00 : f32
    %99 = vector.broadcast %cst_15 : f32 to vector<1x256xf32>
    %100 = arith.select %27, %98, %99 : vector<1x256xi1>, vector<1x256xf32>
    %101 = arith.addf %90, %100 : vector<1x256xf32>
    %c6 = arith.constant 6 : index
    %102 = memref.load %arg1[%c6] : memref<50xf32, #tpu.memory_space<smem>>
    %c31 = arith.constant 31 : index
    %103 = memref.load %arg1[%c31] : memref<50xf32, #tpu.memory_space<smem>>
    %104 = vector.broadcast %102 : f32 to vector<1x324xf32>
    %105 = arith.mulf %104, %35 : vector<1x324xf32>
    %106 = vector.broadcast %103 : f32 to vector<1x324xf32>
    %107 = arith.mulf %106, %36 : vector<1x324xf32>
    %108 = arith.addf %105, %107 : vector<1x324xf32>
    %109 = vector.extract_strided_slice %108 {offsets = [0, 17], sizes = [1, 256], strides = [1, 1]} : vector<1x324xf32> to vector<1x256xf32>
    %cst_16 = arith.constant 0.000000e+00 : f32
    %110 = vector.broadcast %cst_16 : f32 to vector<1x256xf32>
    %111 = arith.select %29, %109, %110 : vector<1x256xi1>, vector<1x256xf32>
    %112 = arith.addf %101, %111 : vector<1x256xf32>
    %c7 = arith.constant 7 : index
    %113 = memref.load %arg1[%c7] : memref<50xf32, #tpu.memory_space<smem>>
    %c32 = arith.constant 32 : index
    %114 = memref.load %arg1[%c32] : memref<50xf32, #tpu.memory_space<smem>>
    %115 = vector.broadcast %113 : f32 to vector<1x324xf32>
    %116 = arith.mulf %115, %35 : vector<1x324xf32>
    %117 = vector.broadcast %114 : f32 to vector<1x324xf32>
    %118 = arith.mulf %117, %36 : vector<1x324xf32>
    %119 = arith.addf %116, %118 : vector<1x324xf32>
    %120 = vector.extract_strided_slice %119 {offsets = [0, 18], sizes = [1, 256], strides = [1, 1]} : vector<1x324xf32> to vector<1x256xf32>
    %121 = arith.addf %112, %120 : vector<1x256xf32>
    %c8 = arith.constant 8 : index
    %122 = memref.load %arg1[%c8] : memref<50xf32, #tpu.memory_space<smem>>
    %c33 = arith.constant 33 : index
    %123 = memref.load %arg1[%c33] : memref<50xf32, #tpu.memory_space<smem>>
    %124 = vector.broadcast %122 : f32 to vector<1x324xf32>
    %125 = arith.mulf %124, %35 : vector<1x324xf32>
    %126 = vector.broadcast %123 : f32 to vector<1x324xf32>
    %127 = arith.mulf %126, %36 : vector<1x324xf32>
    %128 = arith.addf %125, %127 : vector<1x324xf32>
    %129 = vector.extract_strided_slice %128 {offsets = [0, 19], sizes = [1, 256], strides = [1, 1]} : vector<1x324xf32> to vector<1x256xf32>
    %cst_17 = arith.constant 0.000000e+00 : f32
    %130 = vector.broadcast %cst_17 : f32 to vector<1x256xf32>
    %131 = arith.select %31, %129, %130 : vector<1x256xi1>, vector<1x256xf32>
    %132 = arith.addf %121, %131 : vector<1x256xf32>
    %c9 = arith.constant 9 : index
    %133 = memref.load %arg1[%c9] : memref<50xf32, #tpu.memory_space<smem>>
    %c34 = arith.constant 34 : index
    %134 = memref.load %arg1[%c34] : memref<50xf32, #tpu.memory_space<smem>>
    %135 = vector.broadcast %133 : f32 to vector<1x324xf32>
    %136 = arith.mulf %135, %35 : vector<1x324xf32>
    %137 = vector.broadcast %134 : f32 to vector<1x324xf32>
    %138 = arith.mulf %137, %36 : vector<1x324xf32>
    %139 = arith.addf %136, %138 : vector<1x324xf32>
    %140 = vector.extract_strided_slice %139 {offsets = [0, 20], sizes = [1, 256], strides = [1, 1]} : vector<1x324xf32> to vector<1x256xf32>
    %cst_18 = arith.constant 0.000000e+00 : f32
    %141 = vector.broadcast %cst_18 : f32 to vector<1x256xf32>
    %142 = arith.select %33, %140, %141 : vector<1x256xi1>, vector<1x256xf32>
    %143 = arith.addf %132, %142 : vector<1x256xf32>
    %c10 = arith.constant 10 : index
    %144 = memref.load %arg1[%c10] : memref<50xf32, #tpu.memory_space<smem>>
    %c35 = arith.constant 35 : index
    %145 = memref.load %arg1[%c35] : memref<50xf32, #tpu.memory_space<smem>>
    %146 = vector.broadcast %144 : f32 to vector<1x324xf32>
    %147 = arith.mulf %146, %35 : vector<1x324xf32>
    %148 = vector.broadcast %145 : f32 to vector<1x324xf32>
    %149 = arith.mulf %148, %36 : vector<1x324xf32>
    %150 = arith.addf %147, %149 : vector<1x324xf32>
    %151 = vector.extract_strided_slice %150 {offsets = [0, 32], sizes = [1, 256], strides = [1, 1]} : vector<1x324xf32> to vector<1x256xf32>
    %cst_19 = arith.constant 0.000000e+00 : f32
    %152 = vector.broadcast %cst_19 : f32 to vector<1x256xf32>
    %153 = arith.select %27, %151, %152 : vector<1x256xi1>, vector<1x256xf32>
    %154 = arith.addf %143, %153 : vector<1x256xf32>
    %c11 = arith.constant 11 : index
    %155 = memref.load %arg1[%c11] : memref<50xf32, #tpu.memory_space<smem>>
    %c36 = arith.constant 36 : index
    %156 = memref.load %arg1[%c36] : memref<50xf32, #tpu.memory_space<smem>>
    %157 = vector.broadcast %155 : f32 to vector<1x324xf32>
    %158 = arith.mulf %157, %35 : vector<1x324xf32>
    %159 = vector.broadcast %156 : f32 to vector<1x324xf32>
    %160 = arith.mulf %159, %36 : vector<1x324xf32>
    %161 = arith.addf %158, %160 : vector<1x324xf32>
    %162 = vector.extract_strided_slice %161 {offsets = [0, 33], sizes = [1, 256], strides = [1, 1]} : vector<1x324xf32> to vector<1x256xf32>
    %cst_20 = arith.constant 0.000000e+00 : f32
    %163 = vector.broadcast %cst_20 : f32 to vector<1x256xf32>
    %164 = arith.select %29, %162, %163 : vector<1x256xi1>, vector<1x256xf32>
    %165 = arith.addf %154, %164 : vector<1x256xf32>
    %c12 = arith.constant 12 : index
    %166 = memref.load %arg1[%c12] : memref<50xf32, #tpu.memory_space<smem>>
    %c37 = arith.constant 37 : index
    %167 = memref.load %arg1[%c37] : memref<50xf32, #tpu.memory_space<smem>>
    %168 = vector.broadcast %166 : f32 to vector<1x324xf32>
    %169 = arith.mulf %168, %35 : vector<1x324xf32>
    %170 = vector.broadcast %167 : f32 to vector<1x324xf32>
    %171 = arith.mulf %170, %36 : vector<1x324xf32>
    %172 = arith.addf %169, %171 : vector<1x324xf32>
    %173 = vector.extract_strided_slice %172 {offsets = [0, 34], sizes = [1, 256], strides = [1, 1]} : vector<1x324xf32> to vector<1x256xf32>
    %174 = arith.addf %165, %173 : vector<1x256xf32>
    %c13 = arith.constant 13 : index
    %175 = memref.load %arg1[%c13] : memref<50xf32, #tpu.memory_space<smem>>
    %c38 = arith.constant 38 : index
    %176 = memref.load %arg1[%c38] : memref<50xf32, #tpu.memory_space<smem>>
    %177 = vector.broadcast %175 : f32 to vector<1x324xf32>
    %178 = arith.mulf %177, %35 : vector<1x324xf32>
    %179 = vector.broadcast %176 : f32 to vector<1x324xf32>
    %180 = arith.mulf %179, %36 : vector<1x324xf32>
    %181 = arith.addf %178, %180 : vector<1x324xf32>
    %182 = vector.extract_strided_slice %181 {offsets = [0, 35], sizes = [1, 256], strides = [1, 1]} : vector<1x324xf32> to vector<1x256xf32>
    %cst_21 = arith.constant 0.000000e+00 : f32
    %183 = vector.broadcast %cst_21 : f32 to vector<1x256xf32>
    %184 = arith.select %31, %182, %183 : vector<1x256xi1>, vector<1x256xf32>
    %185 = arith.addf %174, %184 : vector<1x256xf32>
    %c14 = arith.constant 14 : index
    %186 = memref.load %arg1[%c14] : memref<50xf32, #tpu.memory_space<smem>>
    %c39 = arith.constant 39 : index
    %187 = memref.load %arg1[%c39] : memref<50xf32, #tpu.memory_space<smem>>
    %188 = vector.broadcast %186 : f32 to vector<1x324xf32>
    %189 = arith.mulf %188, %35 : vector<1x324xf32>
    %190 = vector.broadcast %187 : f32 to vector<1x324xf32>
    %191 = arith.mulf %190, %36 : vector<1x324xf32>
    %192 = arith.addf %189, %191 : vector<1x324xf32>
    %193 = vector.extract_strided_slice %192 {offsets = [0, 36], sizes = [1, 256], strides = [1, 1]} : vector<1x324xf32> to vector<1x256xf32>
    %cst_22 = arith.constant 0.000000e+00 : f32
    %194 = vector.broadcast %cst_22 : f32 to vector<1x256xf32>
    %195 = arith.select %33, %193, %194 : vector<1x256xi1>, vector<1x256xf32>
    %196 = arith.addf %185, %195 : vector<1x256xf32>
    %c15 = arith.constant 15 : index
    %197 = memref.load %arg1[%c15] : memref<50xf32, #tpu.memory_space<smem>>
    %c40 = arith.constant 40 : index
    %198 = memref.load %arg1[%c40] : memref<50xf32, #tpu.memory_space<smem>>
    %199 = vector.broadcast %197 : f32 to vector<1x324xf32>
    %200 = arith.mulf %199, %35 : vector<1x324xf32>
    %201 = vector.broadcast %198 : f32 to vector<1x324xf32>
    %202 = arith.mulf %201, %36 : vector<1x324xf32>
    %203 = arith.addf %200, %202 : vector<1x324xf32>
    %204 = vector.extract_strided_slice %203 {offsets = [0, 48], sizes = [1, 256], strides = [1, 1]} : vector<1x324xf32> to vector<1x256xf32>
    %cst_23 = arith.constant 0.000000e+00 : f32
    %205 = vector.broadcast %cst_23 : f32 to vector<1x256xf32>
    %206 = arith.select %27, %204, %205 : vector<1x256xi1>, vector<1x256xf32>
    %207 = arith.addf %196, %206 : vector<1x256xf32>
    %c16 = arith.constant 16 : index
    %208 = memref.load %arg1[%c16] : memref<50xf32, #tpu.memory_space<smem>>
    %c41 = arith.constant 41 : index
    %209 = memref.load %arg1[%c41] : memref<50xf32, #tpu.memory_space<smem>>
    %210 = vector.broadcast %208 : f32 to vector<1x324xf32>
    %211 = arith.mulf %210, %35 : vector<1x324xf32>
    %212 = vector.broadcast %209 : f32 to vector<1x324xf32>
    %213 = arith.mulf %212, %36 : vector<1x324xf32>
    %214 = arith.addf %211, %213 : vector<1x324xf32>
    %215 = vector.extract_strided_slice %214 {offsets = [0, 49], sizes = [1, 256], strides = [1, 1]} : vector<1x324xf32> to vector<1x256xf32>
    %cst_24 = arith.constant 0.000000e+00 : f32
    %216 = vector.broadcast %cst_24 : f32 to vector<1x256xf32>
    %217 = arith.select %29, %215, %216 : vector<1x256xi1>, vector<1x256xf32>
    %218 = arith.addf %207, %217 : vector<1x256xf32>
    %c17 = arith.constant 17 : index
    %219 = memref.load %arg1[%c17] : memref<50xf32, #tpu.memory_space<smem>>
    %c42 = arith.constant 42 : index
    %220 = memref.load %arg1[%c42] : memref<50xf32, #tpu.memory_space<smem>>
    %221 = vector.broadcast %219 : f32 to vector<1x324xf32>
    %222 = arith.mulf %221, %35 : vector<1x324xf32>
    %223 = vector.broadcast %220 : f32 to vector<1x324xf32>
    %224 = arith.mulf %223, %36 : vector<1x324xf32>
    %225 = arith.addf %222, %224 : vector<1x324xf32>
    %226 = vector.extract_strided_slice %225 {offsets = [0, 50], sizes = [1, 256], strides = [1, 1]} : vector<1x324xf32> to vector<1x256xf32>
    %227 = arith.addf %218, %226 : vector<1x256xf32>
    %c18 = arith.constant 18 : index
    %228 = memref.load %arg1[%c18] : memref<50xf32, #tpu.memory_space<smem>>
    %c43 = arith.constant 43 : index
    %229 = memref.load %arg1[%c43] : memref<50xf32, #tpu.memory_space<smem>>
    %230 = vector.broadcast %228 : f32 to vector<1x324xf32>
    %231 = arith.mulf %230, %35 : vector<1x324xf32>
    %232 = vector.broadcast %229 : f32 to vector<1x324xf32>
    %233 = arith.mulf %232, %36 : vector<1x324xf32>
    %234 = arith.addf %231, %233 : vector<1x324xf32>
    %235 = vector.extract_strided_slice %234 {offsets = [0, 51], sizes = [1, 256], strides = [1, 1]} : vector<1x324xf32> to vector<1x256xf32>
    %cst_25 = arith.constant 0.000000e+00 : f32
    %236 = vector.broadcast %cst_25 : f32 to vector<1x256xf32>
    %237 = arith.select %31, %235, %236 : vector<1x256xi1>, vector<1x256xf32>
    %238 = arith.addf %227, %237 : vector<1x256xf32>
    %c19 = arith.constant 19 : index
    %239 = memref.load %arg1[%c19] : memref<50xf32, #tpu.memory_space<smem>>
    %c44 = arith.constant 44 : index
    %240 = memref.load %arg1[%c44] : memref<50xf32, #tpu.memory_space<smem>>
    %241 = vector.broadcast %239 : f32 to vector<1x324xf32>
    %242 = arith.mulf %241, %35 : vector<1x324xf32>
    %243 = vector.broadcast %240 : f32 to vector<1x324xf32>
    %244 = arith.mulf %243, %36 : vector<1x324xf32>
    %245 = arith.addf %242, %244 : vector<1x324xf32>
    %246 = vector.extract_strided_slice %245 {offsets = [0, 52], sizes = [1, 256], strides = [1, 1]} : vector<1x324xf32> to vector<1x256xf32>
    %cst_26 = arith.constant 0.000000e+00 : f32
    %247 = vector.broadcast %cst_26 : f32 to vector<1x256xf32>
    %248 = arith.select %33, %246, %247 : vector<1x256xi1>, vector<1x256xf32>
    %249 = arith.addf %238, %248 : vector<1x256xf32>
    %c20 = arith.constant 20 : index
    %250 = memref.load %arg1[%c20] : memref<50xf32, #tpu.memory_space<smem>>
    %c45 = arith.constant 45 : index
    %251 = memref.load %arg1[%c45] : memref<50xf32, #tpu.memory_space<smem>>
    %252 = vector.broadcast %250 : f32 to vector<1x324xf32>
    %253 = arith.mulf %252, %35 : vector<1x324xf32>
    %254 = vector.broadcast %251 : f32 to vector<1x324xf32>
    %255 = arith.mulf %254, %36 : vector<1x324xf32>
    %256 = arith.addf %253, %255 : vector<1x324xf32>
    %257 = vector.extract_strided_slice %256 {offsets = [0, 64], sizes = [1, 256], strides = [1, 1]} : vector<1x324xf32> to vector<1x256xf32>
    %cst_27 = arith.constant 0.000000e+00 : f32
    %258 = vector.broadcast %cst_27 : f32 to vector<1x256xf32>
    %259 = arith.select %27, %257, %258 : vector<1x256xi1>, vector<1x256xf32>
    %260 = arith.addf %249, %259 : vector<1x256xf32>
    %c21 = arith.constant 21 : index
    %261 = memref.load %arg1[%c21] : memref<50xf32, #tpu.memory_space<smem>>
    %c46 = arith.constant 46 : index
    %262 = memref.load %arg1[%c46] : memref<50xf32, #tpu.memory_space<smem>>
    %263 = vector.broadcast %261 : f32 to vector<1x324xf32>
    %264 = arith.mulf %263, %35 : vector<1x324xf32>
    %265 = vector.broadcast %262 : f32 to vector<1x324xf32>
    %266 = arith.mulf %265, %36 : vector<1x324xf32>
    %267 = arith.addf %264, %266 : vector<1x324xf32>
    %268 = vector.extract_strided_slice %267 {offsets = [0, 65], sizes = [1, 256], strides = [1, 1]} : vector<1x324xf32> to vector<1x256xf32>
    %cst_28 = arith.constant 0.000000e+00 : f32
    %269 = vector.broadcast %cst_28 : f32 to vector<1x256xf32>
    %270 = arith.select %29, %268, %269 : vector<1x256xi1>, vector<1x256xf32>
    %271 = arith.addf %260, %270 : vector<1x256xf32>
    %c22 = arith.constant 22 : index
    %272 = memref.load %arg1[%c22] : memref<50xf32, #tpu.memory_space<smem>>
    %c47 = arith.constant 47 : index
    %273 = memref.load %arg1[%c47] : memref<50xf32, #tpu.memory_space<smem>>
    %274 = vector.broadcast %272 : f32 to vector<1x324xf32>
    %275 = arith.mulf %274, %35 : vector<1x324xf32>
    %276 = vector.broadcast %273 : f32 to vector<1x324xf32>
    %277 = arith.mulf %276, %36 : vector<1x324xf32>
    %278 = arith.addf %275, %277 : vector<1x324xf32>
    %279 = vector.extract_strided_slice %278 {offsets = [0, 66], sizes = [1, 256], strides = [1, 1]} : vector<1x324xf32> to vector<1x256xf32>
    %280 = arith.addf %271, %279 : vector<1x256xf32>
    %c23 = arith.constant 23 : index
    %281 = memref.load %arg1[%c23] : memref<50xf32, #tpu.memory_space<smem>>
    %c48 = arith.constant 48 : index
    %282 = memref.load %arg1[%c48] : memref<50xf32, #tpu.memory_space<smem>>
    %283 = vector.broadcast %281 : f32 to vector<1x324xf32>
    %284 = arith.mulf %283, %35 : vector<1x324xf32>
    %285 = vector.broadcast %282 : f32 to vector<1x324xf32>
    %286 = arith.mulf %285, %36 : vector<1x324xf32>
    %287 = arith.addf %284, %286 : vector<1x324xf32>
    %288 = vector.extract_strided_slice %287 {offsets = [0, 67], sizes = [1, 256], strides = [1, 1]} : vector<1x324xf32> to vector<1x256xf32>
    %cst_29 = arith.constant 0.000000e+00 : f32
    %289 = vector.broadcast %cst_29 : f32 to vector<1x256xf32>
    %290 = arith.select %31, %288, %289 : vector<1x256xi1>, vector<1x256xf32>
    %291 = arith.addf %280, %290 : vector<1x256xf32>
    %c24 = arith.constant 24 : index
    %292 = memref.load %arg1[%c24] : memref<50xf32, #tpu.memory_space<smem>>
    %c49 = arith.constant 49 : index
    %293 = memref.load %arg1[%c49] : memref<50xf32, #tpu.memory_space<smem>>
    %294 = vector.broadcast %292 : f32 to vector<1x324xf32>
    %295 = arith.mulf %294, %35 : vector<1x324xf32>
    %296 = vector.broadcast %293 : f32 to vector<1x324xf32>
    %297 = arith.mulf %296, %36 : vector<1x324xf32>
    %298 = arith.addf %295, %297 : vector<1x324xf32>
    %299 = vector.extract_strided_slice %298 {offsets = [0, 68], sizes = [1, 256], strides = [1, 1]} : vector<1x324xf32> to vector<1x256xf32>
    %cst_30 = arith.constant 0.000000e+00 : f32
    %300 = vector.broadcast %cst_30 : f32 to vector<1x256xf32>
    %301 = arith.select %33, %299, %300 : vector<1x256xi1>, vector<1x256xf32>
    %302 = arith.addf %291, %301 : vector<1x256xf32>
    %cst_31 = arith.constant 0.000000e+00 : f32
    %303 = vector.broadcast %cst_31 : f32 to vector<1x256xf32>
    %304 = arith.subf %303, %302 : vector<1x256xf32>
    %305 = math.exp %304 : vector<1x256xf32>
    %cst_32 = arith.constant 1.000000e+00 : f32
    %306 = vector.broadcast %cst_32 : f32 to vector<1x256xf32>
    %307 = arith.addf %306, %305 : vector<1x256xf32>
    %308 = tpu.reciprocal %307 : vector<1x256xf32> -> vector<1x256xf32>
    %309 = vector.broadcast %308 : vector<1x256xf32> to vector<4x256xf32>
    %310 = arith.mulf %1, %309 : vector<4x256xf32>
    %c0_33 = arith.constant 0 : index
    %c0_34 = arith.constant 0 : index
    %c0_35 = arith.constant 0 : index
    %311 = vector.load %arg3[%c0_33, %c0_34, %c0_35] : memref<1x4x256xf32, #tpu.memory_space<vmem>>, vector<1x4x256xf32>
    %312 = vector.shape_cast %311 : vector<1x4x256xf32> to vector<4x256xf32>
    %313 = vector.shape_cast %310 : vector<4x256xf32> to vector<1x4x256xf32>
    tpu.vector_store %arg3[%c0_33, %c0_34, %c0_35], %313 {strides = array<i32>} : memref<1x4x256xf32, #tpu.memory_space<vmem>>, vector<1x4x256xf32>,
    return
  }
  func.func @transform_0(%arg0: i32) -> i32 {
    %c0_i32 = arith.constant 0 : i32
    %c0_i32_0 = arith.constant 0 : i32
    return %c0_i32 : i32
  }
  func.func @transform_1(%arg0: i32) -> (i32, i32, i32) {
    %c0_i32 = arith.constant 0 : i32
    %c0_i32_0 = arith.constant 0 : i32
    %c0_i32_1 = arith.constant 0 : i32
    return %arg0, %c0_i32, %c0_i32_0 : i32, i32, i32
  }
  func.func @transform_2(%arg0: i32) -> (i32, i32, i32) {
    %c0_i32 = arith.constant 0 : i32
    %c0_i32_0 = arith.constant 0 : i32
    %c0_i32_1 = arith.constant 0 : i32
    return %arg0, %c0_i32, %c0_i32_0 : i32, i32, i32
  }
}

</mosaic_0001>

<bundles_post_ra>
// kernel: spatial_attention.1
= control target key start
LH: loop header
LB: loop body
LE: loop exit
PB: predicated region body
PF: predicated region fallthrough
CT: control target
= control target key end

     0   :  { %s2290_s0 = inlined_call_operand.vmem [shape: f32[50], index: 0, kind: input, shape index: {}]   ;;  %s2291_s1 = inlined_call_operand.vmem [shape: f32[2,4,256], index: 1, kind: input, shape index: {}]   ;;  %s2292_s2 = inlined_call_operand.vmem [shape: f32[2,4,256], index: 2, kind: output, shape index: {}]  }
   0x1   :  { %2337 = sst [smem:[#allocation28_spill]] %s2290_s0 }
   0x2   :  { %2338 = sst [smem:[#allocation29_spill]] %s2291_s1 }
   0x3   :  { %7 = vsyncpa [#allocation3], 0  ;;  %s1282_s9 = smov 0  }
   0x4 LB: > { %2339 = sst [smem:[#allocation5_spill]] %s1239_s9  ;;  %s1090_s10 = sadd.s32 4294967295, %s1239_s9   ;;  %s1239_s9 = sphi %s1282_s9, %s13_s9  }
   0x5   : > { %p1092_p0 = scmp.ge.s32.totalorder %s1239_s9, 1  ;;  %p91_p1 = scmp.lt.s32.totalorder %s1239_s9, 3 }
   0x6   : > { %s2340_s0 = sld [smem:[#allocation28_spill]]  ;;  %p1168_p3 = scmp.eq.s32.totalorder %s1090_s10, 0 }
   0x7   : > { %p1293_p2 = pnand %p1092_p0, %p91_p1 }
   0x9   : > { %p1164_p4 = pneg %p1293_p2 }
   0xb   : > { %p1165_p5 = pnand %p1168_p3, %p1164_p4 }
   0xc   : > { %s104_s13 = sshll.u32 %s2340_s0, 4  ;;  %s105_s13 = int_to_ptr.vmem [resolvable:$true] %s104_s13 }
   0xd   : > { %s1214_s15 = scalar_lea.vmem %s105_s13, 16  ;;  %p1216_p7 = pneg %p1165_p5 }
   0xe   : > { %p1215_p6 = scmp.ne.s32.totalorder %s105_s13, %s1214_s15  ;;  %p1222_p10 = scmp.lt.s32.totalorder %s105_s13, %s105_s13 }
   0xf   : > { %p1223_p11 = scmp.lt.s32.totalorder %s1214_s15, %s1214_s15 }
  0x10   : > { %p1217_p8 = pnand %p1216_p7, %p1215_p6 }
  0x11   : > { %p1224_p12 = por %p1223_p11, %p1222_p10 }
  0x12   : > { %p1218_p9 = pneg %p1217_p8 }
  0x14   : > { %p1225_p13 = pnand %p1224_p12, %p1218_p9 }
  0x16   : > { %1228 = shalt.err (!%p1225_p13)
}
  0x17   : > { %s1241_s16 = smov [#allocation2]   ;;  %125 = sbr.rel (%p1293_p2) target bundleno = 471 (0x1d7), region = 28 }
  0x18   : > { %1167 = dma.vmem_to_smem (!%p1165_p5), %s105_s13, 16, %s1241_s16, [#allocation3]  }
  0x1e   : > { %1234 = dma.done.wait (%p1168_p3), [#allocation3], 16  }
  0x1f   : > { %1236 = vsyncadd (%p1168_p3), [#allocation3], 4294967280 }
  0x20   : > { %131 = sfence }
  0x21   : > { %p148_p0 = scmp.lt.s32.totalorder %s1090_s10, 1  ;;  %vm162_vm0 = vcmask 1043456   ;;  %s2342_s1 = sld [smem:[#allocation29_spill]]  ;;  %vm232_vm1 = vcmask 277504   ;;  %vm287_vm4 = vcmask 1039360   ;;  %vm318_vm7 = vcmask 1031168  }
  0x22   : > { %s1242_s21 = smov 34   ;;  %s1106_s22 = sld [smem:[#allocation2 + $0x2]]  ;;  %vm347_vm8 = vcmask 1022976   ;;  %vm378_vm10 = vcmask 1014784   ;;  %vm409_vm12 = vcmask 916480   ;;  %vm440_vm13 = vcmask 908288  }
  0x23   : > { %s2390_s10 = smov (!%p148_p0, %s1090_s10), 1  ;;  %s1107_s23 = sld [smem:[#allocation2 + $0x1b]]  ;;  %vm471_vm15 = vcmask 900096  }
  0x24   : > { %s2293_s17 = sshll.u32 %s2390_s10, 3  ;;  %s1104_s24 = sld [smem:[#allocation2 + $0x1]] }
  0x25   : > { %s1105_s25 = sld [smem:[#allocation2 + $0x1a]]  ;;  %s1110_s26 = sld [smem:[#allocation2 + $0x4]] }
  0x26   : > { %s1111_s27 = sld [smem:[#allocation2 + $0x1d]]  ;;  %s1108_s28 = sld [smem:[#allocation2 + $0x3]] }
  0x27   : > { %s1312_s20 = scalar_lea.vmem %s2342_s1, %s2293_s17  ;;  %s1109_s29 = sld [smem:[#allocation2 + $0x1c]] }
  0x28   : > { %v158_v0 = vld [vmem:[%s1312_s20] sm:$0xff]  ;;  %s1114_s30 = sld [smem:[#allocation2 + $0x6]]  ;;  %s1315_s3 = sld [smem:[#allocation2 + $0x1f]]  ;;  %v1347_v32 = vstv %s1106_s22 }
  0x29   : > { %v163_v1 = vsel %vm162_vm0, %v158_v0, -inf  ;;  %v177_v2 = vsel %vm162_vm0, %v158_v0, 0.0  ;;  %v160_v3 = vcombine.high %v158_v0, %v158_v0  ;;  %s1317_s4 = sld [smem:[#allocation2 + $0x5]]  ;;  %s1319_s5 = sld [smem:[#allocation2 + $0x1e]]  ;;  %v1353_v33 = vstv %s1107_s23 }
  0x2a   : > { %v164_v4 = vrot.slane %v163_v1, 4  ;;  %v178_v5 = vrot.slane %v177_v2, 4  ;;  %s1321_s6 = sld [smem:[#allocation2 + $0x8]]  ;;  %s1323_s7 = sld [smem:[#allocation2 + $0x21]]  ;;  %v1355_v34 = vstv %s1104_s24 }
  0x2b   : > { %v170_v6 = vsel %vm162_vm0, %v160_v3, -inf  ;;  %v184_v7 = vsel %vm162_vm0, %v160_v3, 0.0  ;;  %s1325_s8 = sld [smem:[#allocation2 + $0x7]]  ;;  %s1327_s11 = sld [smem:[#allocation2 + $0x20]]  ;;  %v1357_v35 = vstv %s1105_s25  ;;  %v1359_v36 = vstv %s1110_s26 }
  0x2c   : > { %v165_v8 = vmax.f32 %v163_v1, %v164_v4  ;;  %v179_v9 = vadd.f32 %v178_v5, %v177_v2  ;;  %v171_v10 = vrot.slane %v170_v6, 4  ;;  %v185_v11 = vrot.slane %v184_v7, 4  ;;  %s1329_s12 = sld [smem:[#allocation2 + $0xa]]  ;;  %s1331_s13 = sld [smem:[#allocation2 + $0x23]]  ;;  %2343 = vst [vmem:[#allocation6_spill] sm:$0xff] %v1359_v36 }
  0x2d   : > { %s1333_s14 = sld [smem:[#allocation2 + $0x9]]  ;;  %s1335_s15 = sld [smem:[#allocation2 + $0x22]]  ;;  %v1365_v37 = vstv %s1111_s27  ;;  %v1367_v38 = vstv %s1108_s28  ;;  %v1369_v39 = vstv %s1109_s29  ;;  %vm500_vm0 = vcmask 891904  }
  0x2e   : > { %v166_v12 = vrot.slane %v165_v8, 2  ;;  %v180_v13 = vrot.slane %v179_v9, 2  ;;  %v172_v14 = vmax.f32 %v170_v6, %v171_v10  ;;  %v186_v15 = vadd.f32 %v185_v11, %v184_v7  ;;  %s1337_s16 = sld [smem:[#allocation2 + $0xc]]  ;;  %s1339_s18 = sld [smem:[#allocation2 + $0x25]] }
  0x2f   : > { %s1341_s19 = sld [smem:[#allocation2 + $0xb]]  ;;  %s1345_s17 = sld [smem:[#allocation2 + $0xe]]  ;;  %v1371_v40 = vstv %s1114_s30  ;;  %v1378_v41 = vstv %s1315_s3  ;;  %v1381_v42 = vstv %s1317_s4  ;;  %v1384_v43 = vstv %s1319_s5 }
  0x30   : > { %v167_v16 = vmax.f32 %v165_v8, %v166_v12  ;;  %v181_v17 = vadd.f32 %v180_v13, %v179_v9  ;;  %v173_v18 = vrot.slane %v172_v14, 2  ;;  %v187_v19 = vrot.slane %v186_v15, 2  ;;  %s1349_s0 = sld [smem:[#allocation2 + $0x27]]  ;;  %s1351_s1 = sld [smem:[#allocation2 + $0xd]]  ;;  %2344 = vst [vmem:[#allocation7_spill] sm:$0xff] %v1371_v40  ;;  %2345 = vst [vmem:[#allocation8_spill] sm:$0xff] %v1378_v41 }
  0x31   : > { %s1361_s9 = sld [smem:[#allocation2 + $0x26]]  ;;  %s1363_s22 = sld [smem:[#allocation2 + $0x10]]  ;;  %2346 = vst [vmem:[#allocation9_spill] sm:$0xff] %v1381_v42  ;;  %2347 = vst [vmem:[#allocation10_spill] sm:$0xff] %v1384_v43  ;;  %v1387_v44 = vstv %s1321_s6  ;;  %v1396_v46 = vstv %s1323_s7  ;;  %v1399_v47 = vstv %s1325_s8  ;;  %v1402_v48 = vstv %s1327_s11 }
  0x32   : > { %v168_v20 = vrot.slane %v167_v16, 1  ;;  %v182_v21 = vrot.slane %v181_v17, 1  ;;  %v174_v22 = vmax.f32 %v172_v14, %v173_v18  ;;  %v188_v23 = vadd.f32 %v187_v19, %v186_v15  ;;  %s1373_s23 = sld [smem:[#allocation2 + $0x29]]  ;;  %s1375_s24 = sld [smem:[#allocation2 + $0xf]]  ;;  %2348 = vst [vmem:[#allocation11_spill] sm:$0xff] %v1399_v47  ;;  %2349 = vst [vmem:[#allocation12_spill] sm:$0xff] %v1402_v48 }
  0x33   : > { %s1389_s25 = sld [smem:[#allocation2 + $0x28]]  ;;  %s1391_s26 = sld [smem:[#allocation2 + $0x12]]  ;;  %v1405_v49 = vstv %s1329_s12  ;;  %v1416_v51 = vstv %s1331_s13  ;;  %v1419_v52 = vstv %s1333_s14  ;;  %v1422_v53 = vstv %s1335_s15 }
  0x34   : > { %v169_v24 = vmax.f32 %v167_v16, %v168_v20  ;;  %v183_v25 = vadd.f32 %v182_v21, %v181_v17  ;;  %v175_v26 = vrot.slane %v174_v22, 1  ;;  %v189_v27 = vrot.slane %v188_v23, 1  ;;  %s1407_s27 = sld [smem:[#allocation2 + $0x2b]]  ;;  %s1409_s28 = sld [smem:[#allocation2 + $0x11]] }
  0x35   : > { %s1424_s29 = sld [smem:[#allocation2 + $0x2a]]  ;;  %s1426_s30 = sld [smem:[#allocation2 + $0x14]]  ;;  %v1435_v57 = vstv %s1337_s16  ;;  %v1438_v58 = vstv %s1339_s18  ;;  %v1449_v60 = vstv %s1341_s19  ;;  %v1455_v62 = vstv %s1345_s17 }
  0x36   : > { %228 = vrot.lane.b32.xlu0 %v169_v24, %s1242_s21  ;;  %v191_v28 = vmul.f32 0.25, %v183_v25  ;;  %v176_v29 = vmax.f32 %v174_v22, %v175_v26  ;;  %v190_v30 = vadd.f32 %v189_v27, %v188_v23  ;;  %2351 = vst [vmem:[#allocation14_spill] sm:$0xff] %v1435_v57  ;;  %2352 = vst [vmem:[#allocation15_spill] sm:$0xff] %v1438_v58  ;;  %s1440_s3 = sld [smem:[#allocation2 + $0x2d]]  ;;  %s1442_s4 = sld [smem:[#allocation2 + $0x13]]  ;;  %v1466_v1 = vstv %s1349_s0 }
  0x37   : > { %2355 = vst [vmem:[#allocation18_spill] sm:$0xff] %v1455_v62  ;;  %s1457_s5 = sld [smem:[#allocation2 + $0x2c]]  ;;  %s1459_s6 = sld [smem:[#allocation2 + $0x16]]  ;;  %2356 = vst [vmem:[#allocation19_spill] sm:$0xff] %v1466_v1  ;;  %v1469_v2 = vstv %s1351_s1  ;;  %v1480_v5 = vstv %s1361_s9  ;;  %v1483_v6 = vstv %s1363_s22 }
  0x38   : > { %241 = vrot.lane.b32.xlu1 %v191_v28, %s1242_s21  ;;  %v192_v31 = vmul.f32 0.25, %v190_v30  ;;  %2357 = vst [vmem:[#allocation20_spill] sm:$0xff] %v1469_v2  ;;  %s1471_s7 = sld [smem:[#allocation2 + $0x2f]]  ;;  %s1473_s17 = sld [smem:[#allocation2 + $0x15]]  ;;  %2358 = vst [vmem:[#allocation21_spill] sm:$0xff] %v1480_v5  ;;  %v1496_v11 = vstv %s1373_s23  ;;  %v1499_v12 = vstv %s1375_s24 }
  0x39   : > { %2359 = vst [vmem:[#allocation22_spill] sm:$0xff] %v1483_v6  ;;  %s1485_s0 = sld [smem:[#allocation2 + $0x2e]]  ;;  %s1487_s1 = sld [smem:[#allocation2 + $0x18]]  ;;  %2360 = vst [vmem:[#allocation23_spill] sm:$0xff] %v1496_v11  ;;  %v1502_v13 = vstv %s1389_s25  ;;  %v1505_v14 = vstv %s1391_s26 }
  0x3a   : > { %230 = vrot.lane.b32.xlu0 %v176_v29, %s1242_s21  ;;  %s1493_s9 = sld [smem:[#allocation2 + $0x31]]  ;;  %2361 = vst [vmem:[#allocation24_spill] sm:$0xff] %v1499_v12  ;;  %2362 = vst [vmem:[#allocation25_spill] sm:$0xff] %v1502_v13  ;;  %s1243_s8 = smov 126   ;;  %v1510_v15 = vstv %s1407_s27  ;;  %v1513_v16 = vstv %s1409_s28 }
  0x3b   : > { %2363 = vst [vmem:[#allocation26_spill] sm:$0xff] %v1505_v14  ;;  %s1244_s11 = smov 127   ;;  %2364 = vst [vmem:[#allocation27_spill] sm:$0xff] %v1510_v15  ;;  %s1515_s12 = sld [smem:[#allocation2 + $0x17]]  ;;  %v1522_v19 = vstv %s1424_s29  ;;  %v1525_v20 = vstv %s1426_s30 }
  0x3c   : > { %243 = vrot.lane.b32.xlu1 %v192_v31, %s1242_s21  ;;  %s1343_s21 = sld [smem:[#allocation2 + $0x24]]  ;;  %v1536_v27 = vstv %s1440_s3  ;;  %v1539_v28 = vstv %s1442_s4  ;;  %s1245_s13 = smov 124  }
  0x3d   : > { %s1246_s14 = smov 125   ;;  %v1548_v31 = vstv %s1457_s5  ;;  %s1553_s15 = sld [smem:[#allocation2 + $0x30]] }
  0x3e   : > { %s1247_s16 = smov 111   ;;  %s1248_s18 = smov 112  }
  0x3f   : > { %s1249_s19 = smov 109   ;;  %s1251_s22 = smov 96  }
  0x40   : > { %s1252_s23 = smov 108   ;;  %s1253_s24 = smov 94  }
  0x41   : > { %s1254_s25 = smov 95   ;;  %s1255_s26 = smov 92  }
  0x42   : > { %v1452_v61 = vstv %s1343_s21  ;;  %s1250_s21 = smov 110   ;;  %s1256_s27 = smov 93  }
  0x43   : > { %2354 = vst [vmem:[#allocation17_spill] sm:$0xff] %v1452_v61  ;;  %s1257_s28 = smov 79   ;;  %s1258_s29 = smov 80  }
  0x44   : > { %s1259_s30 = smov 77   ;;  %s1260_s3 = smov 78  }
  0x45   : > { %s1261_s4 = smov 64   ;;  %s1262_s5 = smov 76  }
  0xa8   : > { %v1393_v45 = vpop.permute.xlu0 %228 }
  0xa9   : > { %v1413_v50 = vsel %vm232_vm1, 0.0, %v1393_v45 }
  0xaa   : > { %2350 = vst [vmem:[#allocation13_spill] sm:$0xff] %v1413_v50  ;;  %v1428_v54 = vpop.permute.xlu1 %241  ;;  %v299_v55 = vmul.f32 %v1347_v32, %v1413_v50  ;;  %v268_v56 = vmul.f32 %v1355_v34, %v1413_v50  ;;  %v359_v3 = vmul.f32 %v1359_v36, %v1413_v50  ;;  %v328_v4 = vmul.f32 %v1367_v38, %v1413_v50 }
  0xab   : > { %v1446_v59 = vsel %vm232_vm1, 0.0, %v1428_v54  ;;  %v421_v17 = vmul.f32 %v1371_v40, %v1413_v50  ;;  %v390_v18 = vmul.f32 %v1381_v42, %v1413_v50  ;;  %v481_v25 = vmul.f32 %v1387_v44, %v1413_v50 }
  0xac   : > { %2353 = vst [vmem:[#allocation16_spill] sm:$0xff] %v1446_v59  ;;  %v303_v63 = vmul.f32 %v1353_v33, %v1446_v59  ;;  %v272_v0 = vmul.f32 %v1357_v35, %v1446_v59  ;;  %v363_v9 = vmul.f32 %v1365_v37, %v1446_v59  ;;  %v332_v10 = vmul.f32 %v1369_v39, %v1446_v59 }
  0xad   : > { %v425_v23 = vmul.f32 %v1378_v41, %v1446_v59  ;;  %v394_v24 = vmul.f32 %v1384_v43, %v1446_v59  ;;  %v485_v26 = vmul.f32 %v1396_v46, %v1446_v59  ;;  %v452_v29 = vmul.f32 %v1399_v47, %v1413_v50 }
  0xae   : > { %v306_v7 = vadd.f32 %v303_v63, %v299_v55  ;;  %v275_v8 = vadd.f32 %v272_v0, %v268_v56  ;;  %v366_v21 = vadd.f32 %v363_v9, %v359_v3  ;;  %v335_v22 = vadd.f32 %v332_v10, %v328_v4 }
  0xaf   : > { %v456_v30 = vmul.f32 %v1402_v48, %v1446_v59  ;;  %v1551_v55 = vstv %s1459_s6  ;;  %v1556_v56 = vstv %s1471_s7  ;;  %v1559_v63 = vstv %s1473_s17  ;;  %s1823_s6 = sld [smem:[#allocation2]]  ;;  %s1263_s7 = smov 62  }
  0xb0   : > { %312 = vrot.lane.b32.xlu1 %v306_v7, %s1243_s8  ;;  %281 = vrot.lane.b32.xlu0 %v275_v8, %s1244_s11  ;;  %v1562_v0 = vstv %s1485_s0  ;;  %v1565_v3 = vstv %s1487_s1  ;;  %v428_v4 = vadd.f32 %v425_v23, %v421_v17  ;;  %v397_v7 = vadd.f32 %v394_v24, %v390_v18  ;;  %s1264_s17 = smov 63   ;;  %s1859_s0 = sld [smem:[#allocation2 + $0x19]] }
  0xb1   : > { %v543_v8 = vmul.f32 %v1405_v49, %v1413_v50  ;;  %v1570_v9 = vstv %s1493_s9  ;;  %v488_v10 = vadd.f32 %v485_v26, %v481_v25  ;;  %v516_v48 = vmul.f32 %v1422_v53, %v1446_v59  ;;  %v231_v25 = vpop.permute.xlu0 %230  ;;  %v244_v26 = vpop.permute.xlu1 %243  ;;  %s1265_s1 = smov 60   ;;  %s1266_s9 = smov 61  }
  0xb2   : > { %v459_v17 = vadd.f32 %v456_v30, %v452_v29  ;;  %v605_v18 = vmul.f32 %v1435_v57, %v1413_v50  ;;  %v609_v23 = vmul.f32 %v1438_v58, %v1446_v59  ;;  %v1585_v24 = vstv %s1515_s12 }
  0xb3   : > { %v574_v47 = vmul.f32 %v1449_v60, %v1413_v50  ;;  %v669_v29 = vmul.f32 %v1466_v1, %v1446_v59  ;;  %v634_v30 = vmul.f32 %v1469_v2, %v1413_v50  ;;  %v638_v40 = vmul.f32 %v1480_v5, %v1446_v59 }
  0xb4   : > { %372 = vrot.lane.b32.xlu1 %v366_v21, %s1245_s13  ;;  %341 = vrot.lane.b32.xlu0 %v335_v22, %s1246_s14  ;;  %v547_v21 = vmul.f32 %v1416_v51, %v1446_v59  ;;  %v512_v22 = vmul.f32 %v1419_v52, %v1413_v50  ;;  %v727_v41 = vmul.f32 %v1483_v6, %v1413_v50  ;;  %v1616_v6 = vsel %vm232_vm1, %v231_v25, 0.0 }
  0xb5   : > { %v731_v43 = vmul.f32 %v1496_v11, %v1446_v59  ;;  %v696_v42 = vmul.f32 %v1499_v12, %v1413_v50  ;;  %v700_v36 = vmul.f32 %v1502_v13, %v1446_v59  ;;  %v787_v1 = vmul.f32 %v1505_v14, %v1413_v50 }
  0xb6   : > { %v1613_v5 = vsel %vm232_vm1, %v1393_v45, %v231_v25  ;;  %v1620_v11 = vsel %vm232_vm1, %v1428_v54, %v244_v26  ;;  %v1625_v14 = vstv %s1553_s15  ;;  %v519_v13 = vadd.f32 %v516_v48, %v512_v22 }
  0xb7   : > { %v612_v12 = vadd.f32 %v609_v23, %v605_v18  ;;  %v641_v58 = vadd.f32 %v638_v40, %v634_v30  ;;  %v1627_v25 = vadd.f32 %v731_v43, %v727_v41  ;;  %v758_v54 = vmul.f32 %v1513_v16, %v1413_v50 }
  0xb8   : > { %434 = vrot.lane.b32.xlu1 %v428_v4, %s1247_s16  ;;  %403 = vrot.lane.b32.xlu0 %v397_v7, %s1248_s18  ;;  %v578_v4 = vmul.f32 %v1452_v61, %v1446_v59  ;;  %v665_v7 = vmul.f32 %v1455_v62, %v1413_v50  ;;  %v791_v62 = vmul.f32 %v1510_v15, %v1446_v59  ;;  %v1640_v48 = vsel %vm232_vm1, %v244_v26, 0.0 }
  0xb9   : > { %v550_v15 = vadd.f32 %v547_v21, %v543_v8  ;;  %v1631_v57 = vadd.f32 %v700_v36, %v696_v42  ;;  %v849_v8 = vmul.f32 %v1525_v20, %v1413_v50  ;;  %v853_v36 = vmul.f32 %v1536_v27, %v1446_v59 }
  0xba   : > { %v581_v45 = vadd.f32 %v578_v4, %v574_v47  ;;  %v672_v2 = vadd.f32 %v669_v29, %v665_v7  ;;  %v1633_v61 = vadd.f32 %v791_v62, %v787_v1  ;;  %v818_v40 = vmul.f32 %v1539_v28, %v1413_v50 }
  0xbb   : > { %v822_v41 = vmul.f32 %v1548_v31, %v1446_v59  ;;  %v911_v42 = vmul.f32 %v1551_v55, %v1413_v50  ;;  %v915_v43 = vmul.f32 %v1556_v56, %v1446_v59  ;;  %v880_v47 = vmul.f32 %v1559_v63, %v1413_v50 }
  0xbc   : > { %494 = vrot.lane.b32.xlu1 %v488_v10, %s1249_s19  ;;  %465 = vrot.lane.b32.xlu0 %v459_v17, %s1250_s21  ;;  %v762_v10 = vmul.f32 %v1522_v19, %v1446_v59  ;;  %v884_v62 = vmul.f32 %v1562_v0, %v1446_v59  ;;  %v971_v1 = vmul.f32 %v1565_v3, %v1413_v50 }
  0xbd   : > { %v944_v21 = vmul.f32 %v1625_v14, %v1446_v59  ;;  %v270_v22 = vmul.f32 %v1355_v34, %v1616_v6  ;;  %v274_v17 = vmul.f32 %v1357_v35, %v1640_v48  ;;  %v273_v18 = vmul.f32 %v1357_v35, %v1620_v11 }
  0xbe   : > { %v304_v23 = vmul.f32 %v1353_v33, %v1620_v11  ;;  %v765_v26 = vadd.f32 %v762_v10, %v758_v54  ;;  %v301_v4 = vmul.f32 %v1347_v32, %v1616_v6  ;;  %v305_v7 = vmul.f32 %v1353_v33, %v1640_v48 }
  0xbf   : > { %v1680_v29 = vadd.f32 %v853_v36, %v849_v8  ;;  %v1682_v30 = vadd.f32 %v822_v41, %v818_v40  ;;  %v269_v35 = vmul.f32 %v1355_v34, %v1613_v5  ;;  %v1704_v34 = vmul.f32 %v1367_v38, %v1616_v6 }
  0xc0   : > { %556 = vrot.lane.b32.xlu1 %v550_v15, %s1251_s22  ;;  %525 = vrot.lane.b32.xlu0 %v519_v13, %s1252_s23  ;;  %v975_v13 = vmul.f32 %v1570_v9, %v1446_v59  ;;  %v940_v15 = vmul.f32 %v1585_v24, %v1413_v50  ;;  %v1688_v59 = vadd.f32 %v915_v43, %v911_v42 }
  0xc1   : > { %v1696_v50 = vadd.f32 %v274_v17, %v270_v22  ;;  %v1698_v33 = vadd.f32 %v273_v18, %v269_v35  ;;  %v1712_v36 = vmul.f32 %v1369_v39, %v1640_v48  ;;  %v1716_v40 = vmul.f32 %v1367_v38, %v1613_v5 }
  0xc2   : > { %v1692_v54 = vadd.f32 %v975_v13, %v971_v1  ;;  %v1694_v10 = vadd.f32 %v944_v21, %v940_v15  ;;  %v1720_v41 = vmul.f32 %v1369_v39, %v1620_v11  ;;  %v483_v42 = vmul.f32 %v1387_v44, %v1616_v6 }
  0xc3   : > { %v1730_v43 = vmul.f32 %v1365_v37, %v1620_v11  ;;  %v487_v38 = vmul.f32 %v1396_v46, %v1640_v48  ;;  %v514_v39 = vmul.f32 %v1419_v52, %v1616_v6  ;;  %v513_v1 = vmul.f32 %v1419_v52, %v1613_v5 }
  0xc4   : > { %618 = vrot.lane.b32.xlu1 %v612_v12, %s1253_s24  ;;  %587 = vrot.lane.b32.xlu0 %v581_v45, %s1254_s25  ;;  %v300_v12 = vmul.f32 %v1347_v32, %v1613_v5  ;;  %v1690_v45 = vadd.f32 %v884_v62, %v880_v47  ;;  %v1708_v32 = vadd.f32 %v305_v7, %v301_v4 }
  0xc5   : > { %v518_v47 = vmul.f32 %v1422_v53, %v1640_v48  ;;  %v544_v13 = vmul.f32 %v1405_v49, %v1613_v5  ;;  %v548_v52 = vmul.f32 %v1416_v51, %v1620_v11  ;;  %v549_v22 = vmul.f32 %v1416_v51, %v1640_v48  ;;  %v2367_v51 = vld [vmem:[#allocation15_spill] sm:$0xff] }
  0xc6   : > { %v1700_v8 = vadd.f32 %v304_v23, %v300_v12  ;;  %v575_v23 = vmul.f32 %v1449_v60, %v1613_v5  ;;  %v610_v12 = vmul.f32 %v2367_v51, %v1620_v11 }
  0xc7   : > { %v1752_v15 = vadd.f32 %v518_v47, %v514_v39  ;;  %v1764_v17 = vadd.f32 %v548_v52, %v544_v13  ;;  %v2368_v39 = vld [vmem:[#allocation20_spill] sm:$0xff]  ;;  %v2370_v52 = vld [vmem:[#allocation18_spill] sm:$0xff] }
  0xc8   : > { %678 = vrot.lane.b32.xlu1 %v672_v2, %s1255_s26  ;;  %647 = vrot.lane.b32.xlu0 %v641_v58, %s1256_s27  ;;  %v482_v2 = vmul.f32 %v1387_v44, %v1613_v5  ;;  %v486_v58 = vmul.f32 %v1396_v46, %v1620_v11  ;;  %v517_v44 = vmul.f32 %v1422_v53, %v1620_v11 }
  0xc9   : > { %v1750_v46 = vadd.f32 %v487_v38, %v483_v42  ;;  %v545_v53 = vmul.f32 %v1405_v49, %v1616_v6  ;;  %v2366_v49 = vld [vmem:[#allocation14_spill] sm:$0xff]  ;;  %v611_v42 = vmul.f32 %v2367_v51, %v1640_v48  ;;  %v636_v47 = vmul.f32 %v2368_v39, %v1616_v6 }
  0xca   : > { %v1738_v62 = vadd.f32 %v486_v58, %v482_v2  ;;  %v1756_v21 = vadd.f32 %v517_v44, %v513_v1  ;;  %v606_v35 = vmul.f32 %v2366_v49, %v1613_v5  ;;  %v607_v2 = vmul.f32 %v2366_v49, %v1616_v6  ;;  %v2369_v1 = vld [vmem:[#allocation21_spill] sm:$0xff] }
  0xcb   : > { %v1772_v7 = vadd.f32 %v549_v22, %v545_v53  ;;  %v640_v44 = vmul.f32 %v2369_v1, %v1640_v48  ;;  %v666_v53 = vmul.f32 %v2370_v52, %v1613_v5  ;;  %v2371_v22 = vld [vmem:[#allocation19_spill] sm:$0xff] }
  0xcc   : > { %740 = vrot.lane.b32.xlu1 %v1627_v25, %s1257_s28  ;;  %709 = vrot.lane.b32.xlu0 %v1631_v57, %s1258_s29  ;;  %v576_v25 = vmul.f32 %v1449_v60, %v1616_v6  ;;  %v2365_v57 = vld [vmem:[#allocation17_spill] sm:$0xff]  ;;  %v1789_v38 = vadd.f32 %v610_v12, %v606_v35  ;;  %v1797_v13 = vadd.f32 %v611_v42, %v607_v2 }
  0xcd   : > { %v580_v18 = vmul.f32 %v2365_v57, %v1640_v48  ;;  %v579_v4 = vmul.f32 %v2365_v57, %v1620_v11  ;;  %v1805_v57 = vadd.f32 %v640_v44, %v636_v47  ;;  %v2373_v12 = vld [vmem:[#allocation25_spill] sm:$0xff]  ;;  %v2374_v47 = vld [vmem:[#allocation22_spill] sm:$0xff]  ;;  %v2375_v44 = vld [vmem:[#allocation23_spill] sm:$0xff] }
  0xce   : > { %v702_v2 = vmul.f32 %v2373_v12, %v1640_v48 }
  0xcf   : > { %v1783_v60 = vadd.f32 %v580_v18, %v576_v25  ;;  %v1785_v58 = vadd.f32 %v579_v4, %v575_v23  ;;  %v670_v25 = vmul.f32 %v2371_v22, %v1620_v11  ;;  %v667_v18 = vmul.f32 %v2370_v52, %v1616_v6  ;;  %v2372_v4 = vld [vmem:[#allocation24_spill] sm:$0xff] }
  0xd0   : > { %800 = vrot.lane.b32.xlu1 %v1633_v61, %s1259_s30  ;;  %771 = vrot.lane.b32.xlu0 %v765_v26, %s1260_s3  ;;  %v635_v61 = vmul.f32 %v2368_v39, %v1613_v5  ;;  %v639_v26 = vmul.f32 %v2369_v1, %v1620_v11  ;;  %v671_v23 = vmul.f32 %v2371_v22, %v1640_v48 }
  0xd1   : > { %v698_v49 = vmul.f32 %v2372_v4, %v1616_v6  ;;  %v1819_v51 = vadd.f32 %v670_v25, %v666_v53  ;;  %v697_v39 = vmul.f32 %v2372_v4, %v1613_v5  ;;  %v733_v52 = vmul.f32 %v2375_v44, %v1640_v48 }
  0xd2   : > { %v1817_v35 = vadd.f32 %v639_v26, %v635_v61  ;;  %v1825_v42 = vadd.f32 %v671_v23, %v667_v18  ;;  %v732_v61 = vmul.f32 %v2375_v44, %v1620_v11  ;;  %v729_v26 = vmul.f32 %v2374_v47, %v1616_v6 }
  0xd3   : > { %v1833_v1 = vadd.f32 %v702_v2, %v698_v49  ;;  %v760_v22 = vmul.f32 %v1513_v16, %v1616_v6  ;;  %v764_v25 = vmul.f32 %v1522_v19, %v1640_v48  ;;  %v759_v18 = vmul.f32 %v1513_v16, %v1613_v5  ;;  %v2376_v16 = vld [vmem:[#allocation26_spill] sm:$0xff] }
  0xd4   : > { %862 = vrot.lane.b32.xlu1 %v1680_v29, %s1261_s4  ;;  %831 = vrot.lane.b32.xlu0 %v1682_v30, %s1262_s5  ;;  %v701_v29 = vmul.f32 %v2373_v12, %v1620_v11  ;;  %v728_v30 = vmul.f32 %v2374_v47, %v1613_v5  ;;  %v1855_v4 = vadd.f32 %v733_v52, %v729_v26 }
  0xd5   : > { %v763_v49 = vmul.f32 %v1522_v19, %v1620_v11  ;;  %v1861_v12 = vadd.f32 %v764_v25, %v760_v22  ;;  %v788_v2 = vmul.f32 %v2376_v16, %v1613_v5  ;;  %v820_v19 = vmul.f32 %v1539_v28, %v1616_v6 }
  0xd6   : > { %v1841_v53 = vadd.f32 %v701_v29, %v697_v39  ;;  %v1853_v23 = vadd.f32 %v732_v61, %v728_v30  ;;  %v824_v30 = vmul.f32 %v1548_v31, %v1640_v48  ;;  %v819_v61 = vmul.f32 %v1539_v28, %v1613_v5 }
  0xd7   : > { %v1869_v29 = vadd.f32 %v763_v49, %v759_v18  ;;  %v823_v26 = vmul.f32 %v1548_v31, %v1620_v11  ;;  %v850_v52 = vmul.f32 %v1525_v20, %v1613_v5  ;;  %v854_v28 = vmul.f32 %v1536_v27, %v1620_v11 }
  0xd8   : > { %924 = vrot.lane.b32.xlu1 %v1688_v59, %s1263_s7  ;;  %893 = vrot.lane.b32.xlu0 %v1690_v45, %s1264_s17  ;;  %v2377_v59 = vld [vmem:[#allocation27_spill] sm:$0xff]  ;;  %v789_v45 = vmul.f32 %v2376_v16, %v1616_v6  ;;  %v1891_v25 = vadd.f32 %v824_v30, %v820_v19  ;;  %v253_v18 = vstv %s1823_s6  ;;  %v851_v49 = vmul.f32 %v1525_v20, %v1616_v6 }
  0xd9   : > { %v792_v39 = vmul.f32 %v2377_v59, %v1620_v11  ;;  %v793_v47 = vmul.f32 %v2377_v59, %v1640_v48  ;;  %v1896_v31 = vadd.f32 %v823_v26, %v819_v61  ;;  %v1904_v16 = vadd.f32 %v854_v28, %v850_v52 }
  0xda   : > { %v881_v59 = vmul.f32 %v1559_v63, %v1613_v5  ;;  %v912_v20 = vmul.f32 %v1551_v55, %v1613_v5  ;;  %v917_v19 = vmul.f32 %v1556_v56, %v1640_v48  ;;  %v256_v30 = vstv %s1859_s0 }
  0xdb   : > { %v1877_v44 = vadd.f32 %v792_v39, %v788_v2  ;;  %v1889_v22 = vadd.f32 %v793_v47, %v789_v45  ;;  %v886_v2 = vmul.f32 %v1562_v0, %v1640_v48  ;;  %v885_v39 = vmul.f32 %v1562_v0, %v1620_v11 }
  0xdc   : > { %984 = vrot.lane.b32.xlu1 %v1692_v54, %s1265_s1  ;;  %953 = vrot.lane.b32.xlu0 %v1694_v10, %s1266_s9  ;;  %v855_v54 = vmul.f32 %v1536_v27, %v1640_v48  ;;  %v882_v10 = vmul.f32 %v1559_v63, %v1616_v6  ;;  %v916_v27 = vmul.f32 %v1556_v56, %v1620_v11 }
  0xdd   : > { %v913_v47 = vmul.f32 %v1551_v55, %v1616_v6  ;;  %v1926_v0 = vadd.f32 %v885_v39, %v881_v59  ;;  %v942_v26 = vmul.f32 %v1585_v24, %v1616_v6  ;;  %v946_v55 = vmul.f32 %v1625_v14, %v1640_v48  ;;  %v2379_v39 = vld [vmem:[#allocation16_spill] sm:$0xff] }
  0xde   : > { %v1912_v45 = vadd.f32 %v855_v54, %v851_v49  ;;  %v1924_v63 = vadd.f32 %v886_v2, %v882_v10  ;;  %v1931_v61 = vadd.f32 %v916_v27, %v912_v20  ;;  %v945_v52 = vmul.f32 %v1625_v14, %v1620_v11 }
  0xdf   : > { %v972_v56 = vmul.f32 %v1565_v3, %v1613_v5  ;;  %v976_v28 = vmul.f32 %v1570_v9, %v1620_v11  ;;  %v1947_v49 = vadd.f32 %v946_v55, %v942_v26  ;;  %v973_v54 = vmul.f32 %v1565_v3, %v1616_v6 }
  0xe0   : > { %285 = vrot.lane.b32.xlu0 %v1696_v50, %s1244_s11  ;;  %283 = vrot.lane.b32.xlu1 %v1698_v33, %s1244_s11  ;;  %v941_v50 = vmul.f32 %v1585_v24, %v1613_v5  ;;  %v1939_v33 = vadd.f32 %v917_v19, %v913_v47  ;;  %v977_v10 = vmul.f32 %v1570_v9, %v1640_v48  ;;  %v2378_v24 = vld [vmem:[#allocation13_spill] sm:$0xff] }
  0xe1   : > { %v254_v2 = vmul.f32 %v253_v18, %v2378_v24  ;;  %v1960_v59 = vadd.f32 %v976_v28, %v972_v56  ;;  %v257_v20 = vmul.f32 %v256_v30, %v2379_v39  ;;  %v337_v3 = vadd.f32 %v1712_v36, %v1704_v34  ;;  %v2381_v36 = vld [vmem:[#allocation9_spill] sm:$0xff] }
  0xe2   : > { %v1958_v14 = vadd.f32 %v945_v52, %v941_v50  ;;  %v1965_v27 = vadd.f32 %v977_v10, %v973_v54  ;;  %v255_v9 = vmul.f32 %v253_v18, %v1613_v5  ;;  %v258_v47 = vmul.f32 %v256_v30, %v1620_v11  ;;  %v2383_v10 = vld [vmem:[#allocation8_spill] sm:$0xff] }
  0xe3   : > { %v365_v26 = vmul.f32 %v1365_v37, %v1640_v48  ;;  %v1975_v55 = vadd.f32 %v257_v20, %v254_v2  ;;  %v391_v56 = vmul.f32 %v2381_v36, %v1613_v5  ;;  %v426_v24 = vmul.f32 %v2383_v10, %v1620_v11  ;;  %v2384_v2 = vld [vmem:[#allocation7_spill] sm:$0xff] }
  0xe4   : > { %314 = vrot.lane.b32.xlu0 %v1700_v8, %s1243_s8  ;;  %316 = vrot.lane.b32.xlu1 %v1708_v32, %s1243_s8  ;;  %v336_v8 = vadd.f32 %v1720_v41, %v1716_v40  ;;  %v2380_v32 = vld [vmem:[#allocation6_spill] sm:$0xff]  ;;  %v1977_v50 = vadd.f32 %v258_v47, %v255_v9  ;;  %v392_v40 = vmul.f32 %v2381_v36, %v1616_v6  ;;  %s2387_s8 = sshll.u32 %s2390_s10, 3 }
  0xe5   : > { %v361_v19 = vmul.f32 %v2380_v32, %v1616_v6  ;;  %v360_v34 = vmul.f32 %v2380_v32, %v1613_v5  ;;  %v2382_v41 = vld [vmem:[#allocation10_spill] sm:$0xff]  ;;  %v423_v39 = vmul.f32 %v2384_v2, %v1616_v6  ;;  %v422_v20 = vmul.f32 %v2384_v2, %v1613_v5  ;;  %v2386_v32 = vld [vmem:[#allocation12_spill] sm:$0xff] }
  0xe6   : > { %v396_v18 = vmul.f32 %v2382_v41, %v1640_v48  ;;  %v395_v52 = vmul.f32 %v2382_v41, %v1620_v11 }
  0xe7   : > { %v367_v30 = vadd.f32 %v1730_v43, %v360_v34  ;;  %v368_v37 = vadd.f32 %v365_v26, %v361_v19  ;;  %v427_v43 = vmul.f32 %v2383_v10, %v1640_v48  ;;  %v429_v47 = vadd.f32 %v426_v24, %v422_v20 }
  0xe8   : > { %345 = vrot.lane.b32.xlu0 %v337_v3, %s1246_s14  ;;  %343 = vrot.lane.b32.xlu1 %v336_v8, %s1246_s14  ;;  %v399_v28 = vadd.f32 %v396_v18, %v392_v40  ;;  %v398_v54 = vadd.f32 %v395_v52, %v391_v56  ;;  %v2385_v3 = vld [vmem:[#allocation11_spill] sm:$0xff]  ;;  %v458_v19 = vmul.f32 %v2386_v32, %v1640_v48 }
  0xe9   : > { %v454_v9 = vmul.f32 %v2385_v3, %v1616_v6  ;;  %v430_v8 = vadd.f32 %v427_v43, %v423_v39  ;;  %v457_v26 = vmul.f32 %v2386_v32, %v1620_v11  ;;  %v453_v34 = vmul.f32 %v2385_v3, %v1613_v5 }
  0xea   : > { %v193_v11 = vlaneseq }
  0xeb   : > { %v461_v36 = vadd.f32 %v458_v19, %v454_v9  ;;  %v460_v40 = vadd.f32 %v457_v26, %v453_v34 }
  0xec   : > { %374 = vrot.lane.b32.xlu0 %v367_v30, %s1245_s13  ;;  %376 = vrot.lane.b32.xlu1 %v368_v37, %s1245_s13  ;;  %s157_s13 = scalar_lea.vmem %s2292_s2, %s2387_s8 }
  0xf0   : > { %407 = vrot.lane.b32.xlu0 %v399_v28, %s1248_s18  ;;  %405 = vrot.lane.b32.xlu1 %v398_v54, %s1248_s18 }
  0xf4   : > { %436 = vrot.lane.b32.xlu0 %v429_v47, %s1247_s16  ;;  %438 = vrot.lane.b32.xlu1 %v430_v8, %s1247_s16 }
  0xf8   : > { %469 = vrot.lane.b32.xlu0 %v461_v36, %s1250_s21  ;;  %467 = vrot.lane.b32.xlu1 %v460_v40, %s1250_s21 }
  0xfc   : > { %496 = vrot.lane.b32.xlu0 %v1738_v62, %s1249_s19  ;;  %498 = vrot.lane.b32.xlu1 %v1750_v46, %s1249_s19  ;;  %v194_v46 = vand.u32 127, %v193_v11 }
 0x100   : > { %529 = vrot.lane.b32.xlu0 %v1752_v15, %s1252_s23  ;;  %527 = vrot.lane.b32.xlu1 %v1756_v21, %s1252_s23 }
 0x104   : > { %558 = vrot.lane.b32.xlu0 %v1764_v17, %s1251_s22  ;;  %560 = vrot.lane.b32.xlu1 %v1772_v7, %s1251_s22  ;;  %v196_v17 = vcvt.s32.f32 %v194_v46 }
 0x108   : > { %591 = vrot.lane.b32.xlu0 %v1783_v60, %s1254_s25  ;;  %589 = vrot.lane.b32.xlu1 %v1785_v58, %s1254_s25  ;;  %v198_v58 = vmul.f32 0.0625, %v196_v17 }
 0x10c   : > { %620 = vrot.lane.b32.xlu0 %v1789_v38, %s1253_s24  ;;  %622 = vrot.lane.b32.xlu1 %v1797_v13, %s1253_s24 }
 0x110   : > { %651 = vrot.lane.b32.xlu0 %v1805_v57, %s1256_s27  ;;  %649 = vrot.lane.b32.xlu1 %v1817_v35, %s1256_s27  ;;  %v1156_v57 = vtrunc.f32 %v198_v58 }
 0x114   : > { %680 = vrot.lane.b32.xlu0 %v1819_v51, %s1255_s26  ;;  %682 = vrot.lane.b32.xlu1 %v1825_v42, %s1255_s26  ;;  %v1157_v42 = vcvt.f32.s32 %v1156_v57 }
 0x118   : > { %713 = vrot.lane.b32.xlu0 %v1833_v1, %s1258_s29  ;;  %711 = vrot.lane.b32.xlu1 %v1841_v53, %s1258_s29 }
 0x11c   : > { %742 = vrot.lane.b32.xlu0 %v1853_v23, %s1257_s28  ;;  %744 = vrot.lane.b32.xlu1 %v1855_v4, %s1257_s28  ;;  %v202_v23 = vmul.u32 16, %v1157_v42 }
 0x120   : > { %775 = vrot.lane.b32.xlu0 %v1861_v12, %s1260_s3  ;;  %773 = vrot.lane.b32.xlu1 %v1869_v29, %s1260_s3  ;;  %v204_v29 = vsub.s32 %v194_v46, %v202_v23 }
 0x122   : > { %v2056_v5 = vpop.permute.xlu1 %312  ;;  %v282_v6 = vpop.permute.xlu0 %281  ;;  %vm206_vm2 = vcmp.lt.s32.totalorder %v204_v29, 0 }
 0x124   : > { %802 = vrot.lane.b32.xlu0 %v1877_v44, %s1259_s30  ;;  %804 = vrot.lane.b32.xlu1 %v1889_v22, %s1259_s30 }
 0x126   : > { %v2062_v48 = vpop.permute.xlu1 %372  ;;  %v2064_v62 = vpop.permute.xlu0 %341 }
 0x128   : > { %835 = vrot.lane.b32.xlu0 %v1891_v25, %s1262_s5  ;;  %833 = vrot.lane.b32.xlu1 %v1896_v31, %s1262_s5  ;;  %v208_v25 = vadd.s32 16, %v204_v29 }
 0x12a   : > { %v2071_v15 = vpop.permute.xlu1 %434  ;;  %v2073_v21 = vpop.permute.xlu0 %403 }
 0x12c   : > { %864 = vrot.lane.b32.xlu0 %v1904_v16, %s1261_s4  ;;  %866 = vrot.lane.b32.xlu1 %v1912_v45, %s1261_s4  ;;  %v210_v45 = vsel %vm206_vm2, %v208_v25, %v204_v29  ;;  %vm531_vm2 = vcmask 883712  }
 0x12d   : > { %vm212_vm3 = vcmp.ge.s32.totalorder %v210_v45, 16 }
 0x12e   : > { %v2079_v7 = vpop.permute.xlu1 %494  ;;  %v2081_v60 = vpop.permute.xlu0 %465 }
 0x130   : > { %897 = vrot.lane.b32.xlu0 %v1924_v63, %s1264_s17  ;;  %895 = vrot.lane.b32.xlu1 %v1926_v0, %s1264_s17 }
 0x132   : > { %v2087_v38 = vpop.permute.xlu1 %556  ;;  %v2089_v13 = vpop.permute.xlu0 %525 }
 0x134   : > { %926 = vrot.lane.b32.xlu0 %v1931_v61, %s1263_s7  ;;  %928 = vrot.lane.b32.xlu1 %v1939_v33, %s1263_s7  ;;  %v1101_v61 = vadd.s32 4294967280, %v210_v45  ;;  %v195_v33 = vadd.s32 128, %v194_v46 }
 0x136   : > { %v2095_v35 = vpop.permute.xlu1 %618  ;;  %v2097_v51 = vpop.permute.xlu0 %587 }
 0x138   : > { %957 = vrot.lane.b32.xlu0 %v1947_v49, %s1266_s9  ;;  %955 = vrot.lane.b32.xlu1 %v1958_v14, %s1266_s9 }
 0x13a   : > { %v2103_v1 = vpop.permute.xlu1 %678  ;;  %v2105_v53 = vpop.permute.xlu0 %647 }
 0x13c   : > { %986 = vrot.lane.b32.xlu0 %v1960_v59, %s1265_s1  ;;  %988 = vrot.lane.b32.xlu1 %v1965_v27, %s1265_s1  ;;  %v2131_v59 = vsel %vm212_vm3, %v1101_v61, %v210_v45  ;;  %v197_v27 = vcvt.s32.f32 %v195_v33 }
 0x13d   : > { %vm218_vm5 = vcmp.ge.s32.totalorder %v2131_v59, 2  ;;  %vm220_vm6 = vcmp.ge.s32.totalorder %v2131_v59, 1  ;;  %vm222_vm9 = vcmp.lt.s32.totalorder %v2131_v59, 15  ;;  %vm224_vm11 = vcmp.lt.s32.totalorder %v2131_v59, 14 }
 0x13e   : > { %v2111_v4 = vpop.permute.xlu1 %740  ;;  %v2113_v12 = vpop.permute.xlu0 %709  ;;  %v199_v37 = vmul.f32 0.0625, %v197_v27  ;;  %v261_v52 = vsel %vm218_vm5, %v1975_v55, 0.0  ;;  %v1010_v59 = vshrl.u32 %v193_v11, 7 }
 0x140   : > { %v1158_v24 = vtrunc.f32 %v199_v37 }
 0x142   : > { %v2115_v44 = vpop.permute.xlu1 %800  ;;  %v2117_v22 = vpop.permute.xlu0 %771  ;;  %v1159_v20 = vcvt.f32.s32 %v1158_v24 }
 0x144   : > { %v203_v19 = vmul.u32 16, %v1159_v20 }
 0x146   : > { %v2119_v31 = vpop.permute.xlu1 %862  ;;  %v2121_v16 = vpop.permute.xlu0 %831 }
 0x14a   : > { %v2123_v63 = vpop.permute.xlu1 %924  ;;  %v2125_v0 = vpop.permute.xlu0 %893 }
 0x14e   : > { %v2127_v49 = vpop.permute.xlu1 %984  ;;  %v2129_v14 = vpop.permute.xlu0 %953 }
 0x152   : > { %v2135_v41 = vpop.permute.xlu1 %283  ;;  %v2137_v18 = vpop.permute.xlu0 %285 }
 0x153   : > { %v288_v30 = vsel %vm287_vm4, %v282_v6, %v2135_v41  ;;  %v205_v6 = vsub.s32 %v195_v33, %v203_v19 }
 0x154   : > { %v292_v56 = vsel %vm220_vm6, %v288_v30, 0.0 }
 0x155   : > { %v294_v28 = vadd.f32 %v292_v56, %v261_v52  ;;  %v209_v42 = vadd.s32 16, %v205_v6  ;;  %vm207_vm14 = vcmp.lt.s32.totalorder %v205_v6, 0 }
 0x156   : > { %v2146_v54 = vpop.permute.xlu1 %316  ;;  %v2148_v10 = vpop.permute.xlu0 %314 }
 0x157   : > { %v319_v2 = vsel %vm318_vm7, %v2056_v5, %v2148_v10 }
 0x158   : > { %v323_v39 = vadd.f32 %v319_v2, %v294_v28 }
 0x15a   : > { %v344_v43 = vpop.permute.xlu1 %343  ;;  %v346_v55 = vpop.permute.xlu0 %345 }
 0x15b   : > { %v348_v3 = vsel %vm347_vm8, %v2064_v62, %v344_v43 }
 0x15c   : > { %v352_v9 = vsel %vm222_vm9, %v348_v3, 0.0 }
 0x15d   : > { %v354_v47 = vadd.f32 %v352_v9, %v323_v39 }
 0x15e   : > { %v377_v8 = vpop.permute.xlu1 %376  ;;  %v375_v32 = vpop.permute.xlu0 %374 }
 0x15f   : > { %v379_v26 = vsel %vm378_vm10, %v2062_v48, %v375_v32 }
 0x160   : > { %v383_v34 = vsel %vm224_vm11, %v379_v26, 0.0 }
 0x161   : > { %v385_v36 = vadd.f32 %v383_v34, %v354_v47 }
 0x162   : > { %v406_v40 = vpop.permute.xlu1 %405  ;;  %v408_v5 = vpop.permute.xlu0 %407 }
 0x163   : > { %v410_v62 = vsel %vm409_vm12, %v2073_v21, %v406_v40  ;;  %v211_v21 = vsel %vm207_vm14, %v209_v42, %v205_v6 }
 0x164   : > { %v414_v46 = vsel %vm218_vm5, %v410_v62, 0.0  ;;  %v1102_v27 = vadd.s32 4294967280, %v211_v21  ;;  %vm213_vm1 = vcmp.ge.s32.totalorder %v211_v21, 16 }
 0x165   : > { %v416_v17 = vadd.f32 %v414_v46, %v385_v36  ;;  %v380_v36 = vsel %vm378_vm10, %v375_v32, %v377_v8  ;;  %vm653_vm10 = vcmask 760832  }
 0x166   : > { %v439_v58 = vpop.permute.xlu1 %438  ;;  %v437_v57 = vpop.permute.xlu0 %436  ;;  %v2177_v28 = vsel %vm213_vm1, %v1102_v27, %v211_v21 }
 0x167   : > { %v441_v48 = vsel %vm440_vm13, %v2071_v15, %v437_v57  ;;  %vm221_vm3 = vcmp.ge.s32.totalorder %v2177_v28, 1  ;;  %vm219_vm14 = vcmp.ge.s32.totalorder %v2177_v28, 2  ;;  %vm225_vm1 = vcmp.lt.s32.totalorder %v2177_v28, 14 }
 0x168   : > { %v445_v23 = vsel %vm220_vm6, %v441_v48, 0.0  ;;  %v262_v19 = vsel %vm219_vm14, %v1977_v50, 0.0  ;;  %v411_v50 = vsel %vm409_vm12, %v406_v40, %v408_v5  ;;  %v384_v46 = vsel %vm225_vm1, %v380_v36, 0.0 }
 0x169   : > { %v447_v29 = vadd.f32 %v445_v23, %v416_v17  ;;  %vm624_vm12 = vcmask 769024  }
 0x16a   : > { %v468_v25 = vpop.permute.xlu1 %467  ;;  %v470_v45 = vpop.permute.xlu0 %469 }
 0x16b   : > { %v472_v61 = vsel %vm471_vm15, %v2081_v60, %v468_v25  ;;  %v289_v60 = vsel %vm287_vm4, %v2135_v41, %v2137_v18  ;;  %vm223_vm4 = vcmp.lt.s32.totalorder %v2177_v28, 15  ;;  %v320_v41 = vsel %vm318_vm7, %v2148_v10, %v2146_v54 }
 0x16c   : > { %v476_v33 = vadd.f32 %v472_v61, %v447_v29  ;;  %v293_v3 = vsel %vm221_vm3, %v289_v60, 0.0  ;;  %v442_v54 = vsel %vm440_vm13, %v437_v57, %v439_v58  ;;  %v415_v10 = vsel %vm219_vm14, %v411_v50, 0.0 }
 0x16d   : > { %v295_v26 = vadd.f32 %v293_v3, %v262_v19  ;;  %v446_v8 = vsel %vm221_vm3, %v442_v54, 0.0  ;;  %v473_v5 = vsel %vm471_vm15, %v468_v25, %v470_v45  ;;  %vm562_vm7 = vcmask 785408  }
 0x16e   : > { %v499_v30 = vpop.permute.xlu1 %498  ;;  %v497_v37 = vpop.permute.xlu0 %496  ;;  %vm684_vm13 = vcmask 752640   ;;  %vm715_vm15 = vcmask 654336   ;;  %v1011_v28 = vsub.s32 0, %v1010_v59 }
 0x16f   : > { %v501_v15 = vsel %vm500_vm0, %v2079_v7, %v497_v37  ;;  %v324_v62 = vadd.f32 %v320_v41, %v295_v26  ;;  %v502_v40 = vsel %vm500_vm0, %v497_v37, %v499_v30  ;;  %vm746_vm0 = vcmask 646144  }
 0x170   : > { %v505_v52 = vsel %vm222_vm9, %v501_v15, 0.0  ;;  %v506_v57 = vsel %vm223_vm4, %v502_v40, 0.0 }
 0x171   : > { %v507_v56 = vadd.f32 %v505_v52, %v476_v33 }
 0x172   : > { %v528_v24 = vpop.permute.xlu1 %527  ;;  %v530_v2 = vpop.permute.xlu0 %529 }
 0x173   : > { %v532_v39 = vsel %vm531_vm2, %v2089_v13, %v528_v24  ;;  %v349_v13 = vsel %vm347_vm8, %v344_v43, %v346_v55  ;;  %v533_v58 = vsel %vm531_vm2, %v528_v24, %v530_v2  ;;  %vm593_vm8 = vcmask 777216  }
 0x174   : > { %v536_v7 = vsel %vm224_vm11, %v532_v39, 0.0  ;;  %v353_v6 = vsel %vm223_vm4, %v349_v13, 0.0  ;;  %v537_v52 = vsel %vm225_vm1, %v533_v58, 0.0  ;;  %vm806_vm2 = vcmask 629760  }
 0x175   : > { %v538_v20 = vadd.f32 %v536_v7, %v507_v56  ;;  %v355_v17 = vadd.f32 %v353_v6, %v324_v62 }
 0x176   : > { %v561_v9 = vpop.permute.xlu1 %560  ;;  %v559_v47 = vpop.permute.xlu0 %558 }
 0x177   : > { %v386_v42 = vadd.f32 %v384_v46, %v355_v17  ;;  %v563_v27 = vsel %vm562_vm7, %v2087_v38, %v559_v47  ;;  %v564_v15 = vsel %vm562_vm7, %v559_v47, %v561_v9  ;;  %vm777_vm7 = vcmask 637952  }
 0x178   : > { %v567_v24 = vsel %vm218_vm5, %v563_v27, 0.0  ;;  %v568_v2 = vsel %vm219_vm14, %v564_v15, 0.0 }
 0x179   : > { %v417_v23 = vadd.f32 %v415_v10, %v386_v42  ;;  %v569_v9 = vadd.f32 %v567_v24, %v538_v20 }
 0x17a   : > { %v590_v18 = vpop.permute.xlu1 %589  ;;  %v592_v34 = vpop.permute.xlu0 %591 }
 0x17b   : > { %v448_v29 = vadd.f32 %v446_v8, %v417_v23  ;;  %v594_v25 = vsel %vm593_vm8, %v2097_v51, %v590_v18  ;;  %v595_v45 = vsel %vm593_vm8, %v590_v18, %v592_v34  ;;  %vm837_vm8 = vcmask 621568  }
 0x17c   : > { %v598_v38 = vsel %vm220_vm6, %v594_v25, 0.0  ;;  %v599_v39 = vsel %vm221_vm3, %v595_v45, 0.0 }
 0x17d   : > { %v477_v33 = vadd.f32 %v473_v5, %v448_v29  ;;  %v600_v51 = vadd.f32 %v598_v38, %v569_v9 }
 0x17e   : > { %v623_v43 = vpop.permute.xlu1 %622  ;;  %v621_v55 = vpop.permute.xlu0 %620 }
 0x17f   : > { %v508_v37 = vadd.f32 %v506_v57, %v477_v33  ;;  %v625_v41 = vsel %vm624_vm12, %v2095_v35, %v621_v55  ;;  %v626_v18 = vsel %vm624_vm12, %v621_v55, %v623_v43  ;;  %vm899_vm12 = vcmask 515072  }
 0x180   : > { %v629_v46 = vadd.f32 %v625_v41, %v600_v51 }
 0x181   : > { %v539_v60 = vadd.f32 %v537_v52, %v508_v37 }
 0x182   : > { %v650_v32 = vpop.permute.xlu1 %649  ;;  %v652_v48 = vpop.permute.xlu0 %651 }
 0x183   : > { %v570_v47 = vadd.f32 %v568_v2, %v539_v60  ;;  %v654_v26 = vsel %vm653_vm10, %v2105_v53, %v650_v32  ;;  %v655_v13 = vsel %vm653_vm10, %v650_v32, %v652_v48  ;;  %vm868_vm10 = vcmask 523264  }
 0x184   : > { %v658_v20 = vsel %vm222_vm9, %v654_v26, 0.0  ;;  %v659_v50 = vsel %vm223_vm4, %v655_v13, 0.0 }
 0x185   : > { %v601_v19 = vadd.f32 %v599_v39, %v570_v47  ;;  %v660_v10 = vadd.f32 %v658_v20, %v629_v46 }
 0x186   : > { %v683_v21 = vpop.permute.xlu1 %682  ;;  %v681_v61 = vpop.permute.xlu0 %680 }
 0x187   : > { %v685_v6 = vsel %vm684_vm13, %v2103_v1, %v681_v61  ;;  %v686_v62 = vsel %vm684_vm13, %v681_v61, %v683_v21  ;;  %v630_v17 = vadd.f32 %v626_v18, %v601_v19  ;;  %vm930_vm13 = vcmask 506880  }
 0x188   : > { %v689_v35 = vsel %vm224_vm11, %v685_v6, 0.0  ;;  %v690_v43 = vsel %vm225_vm1, %v686_v62, 0.0 }
 0x189   : > { %v661_v42 = vadd.f32 %v659_v50, %v630_v17  ;;  %v691_v23 = vadd.f32 %v689_v35, %v660_v10 }
 0x18a   : > { %v712_v56 = vpop.permute.xlu1 %711  ;;  %v714_v30 = vpop.permute.xlu0 %713 }
 0x18b   : > { %v716_v53 = vsel %vm715_vm15, %v2113_v12, %v712_v56  ;;  %v717_v54 = vsel %vm715_vm15, %v712_v56, %v714_v30  ;;  %v692_v29 = vadd.f32 %v690_v43, %v661_v42  ;;  %vm959_vm15 = vcmask 498688  }
 0x18c   : > { %v720_v48 = vsel %vm218_vm5, %v716_v53, 0.0  ;;  %v721_v12 = vsel %vm219_vm14, %v717_v54, 0.0 }
 0x18d   : > { %v722_v58 = vadd.f32 %v720_v48, %v691_v23 }
 0x18e   : > { %v745_v7 = vpop.permute.xlu1 %744  ;;  %v743_v3 = vpop.permute.xlu0 %742 }
 0x18f   : > { %v747_v8 = vsel %vm746_vm0, %v2111_v4, %v743_v3  ;;  %v748_v32 = vsel %vm746_vm0, %v743_v3, %v745_v7  ;;  %v723_v4 = vadd.f32 %v721_v12, %v692_v29 }
 0x190   : > { %v751_v40 = vsel %vm220_vm6, %v747_v8, 0.0  ;;  %v752_v5 = vsel %vm221_vm3, %v748_v32, 0.0 }
 0x191   : > { %v753_v57 = vadd.f32 %v751_v40, %v722_v58  ;;  %v754_v33 = vadd.f32 %v752_v5, %v723_v4 }
 0x192   : > { %v774_v34 = vpop.permute.xlu1 %773  ;;  %v776_v36 = vpop.permute.xlu0 %775 }
 0x193   : > { %v778_v52 = vsel %vm777_vm7, %v2117_v22, %v774_v34  ;;  %v779_v56 = vsel %vm777_vm7, %v774_v34, %v776_v36 }
 0x194   : > { %v782_v60 = vadd.f32 %v778_v52, %v753_v57  ;;  %v783_v38 = vadd.f32 %v779_v56, %v754_v33 }
 0x196   : > { %v805_v1 = vpop.permute.xlu1 %804  ;;  %v803_v55 = vpop.permute.xlu0 %802 }
 0x197   : > { %v807_v27 = vsel %vm806_vm2, %v2115_v44, %v803_v55  ;;  %v808_v15 = vsel %vm806_vm2, %v803_v55, %v805_v1 }
 0x198   : > { %v811_v24 = vsel %vm222_vm9, %v807_v27, 0.0  ;;  %v812_v2 = vsel %vm223_vm4, %v808_v15, 0.0 }
 0x199   : > { %v813_v9 = vadd.f32 %v811_v24, %v782_v60  ;;  %v814_v47 = vadd.f32 %v812_v2, %v783_v38 }
 0x19a   : > { %v834_v21 = vpop.permute.xlu1 %833  ;;  %v836_v61 = vpop.permute.xlu0 %835 }
 0x19b   : > { %v838_v25 = vsel %vm837_vm8, %v2121_v16, %v834_v21  ;;  %v839_v45 = vsel %vm837_vm8, %v834_v21, %v836_v61 }
 0x19c   : > { %v842_v22 = vsel %vm224_vm11, %v838_v25, 0.0  ;;  %v843_v7 = vsel %vm225_vm1, %v839_v45, 0.0  ;;  %v1213_v25 = vld [vmem:[%s1312_s20] sm:$0xff] }
 0x19d   : > { %v844_v13 = vadd.f32 %v842_v22, %v813_v9  ;;  %v845_v41 = vadd.f32 %v843_v7, %v814_v47 }
 0x19e   : > { %v867_v30 = vpop.permute.xlu1 %866  ;;  %v865_v37 = vpop.permute.xlu0 %864 }
 0x19f   : > { %v869_v44 = vsel %vm868_vm10, %v2119_v31, %v865_v37  ;;  %v870_v39 = vsel %vm868_vm10, %v865_v37, %v867_v30 }
 0x1a0   : > { %v873_v26 = vsel %vm218_vm5, %v869_v44, 0.0  ;;  %v874_v31 = vsel %vm219_vm14, %v870_v39, 0.0  ;;  %vm990_vm5 = vcmask 490496  }
 0x1a1   : > { %v875_v62 = vadd.f32 %v873_v26, %v844_v13  ;;  %v876_v20 = vadd.f32 %v874_v31, %v845_v41 }
 0x1a2   : > { %v896_v16 = vpop.permute.xlu1 %895  ;;  %v898_v3 = vpop.permute.xlu0 %897 }
 0x1a3   : > { %v900_v51 = vsel %vm899_vm12, %v2125_v0, %v896_v16  ;;  %v901_v19 = vsel %vm899_vm12, %v896_v16, %v898_v3 }
 0x1a4   : > { %v904_v18 = vsel %vm220_vm6, %v900_v51, 0.0  ;;  %v905_v34 = vsel %vm221_vm3, %v901_v19, 0.0 }
 0x1a5   : > { %v906_v0 = vadd.f32 %v904_v18, %v875_v62  ;;  %v907_v50 = vadd.f32 %v905_v34, %v876_v20 }
 0x1a6   : > { %v929_v36 = vpop.permute.xlu1 %928  ;;  %v927_v6 = vpop.permute.xlu0 %926 }
 0x1a7   : > { %v931_v46 = vsel %vm930_vm13, %v2123_v63, %v927_v6  ;;  %v932_v17 = vsel %vm930_vm13, %v927_v6, %v929_v36 }
 0x1a8   : > { %v935_v10 = vadd.f32 %v931_v46, %v906_v0  ;;  %v936_v42 = vadd.f32 %v932_v17, %v907_v50 }
 0x1aa   : > { %v956_v53 = vpop.permute.xlu1 %955  ;;  %v958_v54 = vpop.permute.xlu0 %957 }
 0x1ab   : > { %v960_v35 = vsel %vm959_vm15, %v2129_v14, %v956_v53  ;;  %v961_v43 = vsel %vm959_vm15, %v956_v53, %v958_v54 }
 0x1ac   : > { %v964_v1 = vsel %vm222_vm9, %v960_v35, 0.0  ;;  %v965_v55 = vsel %vm223_vm4, %v961_v43, 0.0 }
 0x1ad   : > { %v966_v48 = vadd.f32 %v964_v1, %v935_v10  ;;  %v967_v12 = vadd.f32 %v965_v55, %v936_v42 }
 0x1ae   : > { %v989_v8 = vpop.permute.xlu1 %988  ;;  %v987_v32 = vpop.permute.xlu0 %986 }
 0x1af   : > { %v991_v63 = vsel %vm990_vm5, %v2127_v49, %v987_v32  ;;  %v992_v23 = vsel %vm990_vm5, %v987_v32, %v989_v8 }
 0x1b0   : > { %v995_v14 = vsel %vm224_vm11, %v991_v63, 0.0  ;;  %v996_v29 = vsel %vm225_vm1, %v992_v23, 0.0 }
 0x1b1   : > { %v997_v40 = vadd.f32 %v995_v14, %v966_v48  ;;  %v998_v5 = vadd.f32 %v996_v29, %v967_v12 }
 0x1b3   : > { %v999_v21 = vsub.f32 0.0, %v997_v40  ;;  %v1000_v61 = vsub.f32 0.0, %v998_v5 }
 0x1b5   : > { %v1001_v58 = vmul.f32 1.442695, %v999_v21  ;;  %v1003_v4 = vmul.f32 1.442695, %v1000_v61 }
 0x1b7   : > { %1205 = vpow2.f32 %v1001_v58 }
 0x1b8   : > { %1207 = vpow2.f32 %v1003_v4 }
 0x1c1   : > { %v1206_v57 = vpop.eup %1205 }
 0x1c2   : > { %v1208_v33 = vpop.eup %1207  ;;  %v1005_v49 = vadd.f32 1.0, %v1206_v57 }
 0x1c3   : > { %v1006_v27 = vadd.f32 1.0, %v1208_v33 }
 0x1c4   : > { %1209 = vrcp.f32 %v1005_v49 }
 0x1c5   : > { %1211 = vrcp.f32 %v1006_v27 }
 0x1ce   : > { %v1210_v15 = vpop.eup %1209 }
 0x1cf   : > { %v1212_v52 = vpop.eup %1211  ;;  %v1012_v56 = vrot.slane %v1210_v15, %v1011_v28 }
 0x1d0   : > { %v1016_v30 = vrot.slane %v1212_v52, %v1011_v28 }
 0x1d2   : > { %v1019_v37 = vcombine.low %v1012_v56, %v1016_v30 }
 0x1d4   : > { %v1021_v45 = vmul.f32 %v1213_v25, %v1019_v37 }
 0x1d6   : > { %1022 = vst [vmem:[%s157_s13] sm:$0xff] %v1021_v45 }
 0x1d7 PF: > { %s2388_s14 = sld [smem:[#allocation5_spill]] }
 0x1dd   : > { %s13_s9 = sadd.s32 1, %s2388_s14  }
 0x1de   : > { %p10_p1 = scmp.ge.s32.totalorder %s13_s9, 4  }
 0x1e0   :  { %12 = sbr.rel (!%p10_p1) target bundleno = 4 (0x4), region = 63 }
 0x1e7   :  { %1044 = vsyncpa [#allocation3], 1 }
 0x1e8   :  { %1046 = vsyncpa [#allocation3 + $0x1], 1 }

</bundles_post_ra>
